<compile_context>
chip_gen: v5e
topology: v5e:2x2
jax: 0.10.0
libtpu: 0.0.40
codegen_flags: <defaults>
</compile_context>

<pallas_src>
import functools

import jax
import jax.numpy as jnp
from jax import lax
from jax.experimental import pallas as pl
from jax.experimental.pallas import tpu as pltpu


def _round_up(x, m):
    return (x + m - 1) // m * m


def _gate_kernel(pts_ref, img1_ref, feat_ref, b1_ref, w2_ref, b2_ref, out_ref,
                 *, H, W, use_roll):
    HW = H * W
    p = pts_ref[0]                         # (2, TN) f32
    gx = p[0:1, :]                         # (1, TN) normalized x in [-1, 1]
    gy = p[1:2, :]                         # (1, TN) normalized y in [-1, 1]
    TN = gx.shape[-1]

    # --- grid_sample: bilinear, padding_mode='zeros', align_corners=False ----
    ix = (gx + 1.0) * (W * 0.5) - 0.5
    iy = (gy + 1.0) * (H * 0.5) - 0.5
    x0f = jnp.floor(ix)
    y0f = jnp.floor(iy)
    wx1 = ix - x0f
    wx0 = 1.0 - wx1
    wy1 = iy - y0f
    wy0 = 1.0 - wy1
    x0 = x0f.astype(jnp.int32)
    y0 = y0f.astype(jnp.int32)

    # Per-corner validity (zeros padding): invalid corners contribute nothing.
    # Masking the 1-D factors is equivalent to masking the 2-D products and
    # saves a few VPU ops (all on tiny (1, TN) tensors anyway).
    wx0m = jnp.where((x0 >= 0) & (x0 <= W - 1), wx0, 0.0)
    wx1m = jnp.where((x0 >= -1) & (x0 <= W - 2), wx1, 0.0)   # x1 = x0+1 valid
    wy0m = jnp.where((y0 >= 0) & (y0 <= H - 1), wy0, 0.0)
    wy1m = jnp.where((y0 >= -1) & (y0 <= H - 2), wy1, 0.0)   # y1 = y0+1 valid
    w00 = wy0m * wx0m
    w01 = wy0m * wx1m
    w10 = wy1m * wx0m
    w11 = wy1m * wx1m

    flat = y0 * W + x0                                      # (1, TN) int32
    iota = lax.broadcasted_iota(jnp.int32, (HW, TN), 0)

    if use_roll:
        # One compare for the base (y0, x0) corner; the other 3 corners are the
        # same one-hot shifted by 1 / W / W+1 rows -> XLU rolls (VPU stays
        # free).  flat can be negative near the top/left border while a
        # neighbor corner is still valid: floor-mod keeps it congruent mod HW,
        # so the wrapped roll lands on the correct row; any invalid corner's
        # weight is already zeroed, so aliased rows contribute nothing.
        fw = jnp.mod(flat, HW)
        base = (iota == fw).astype(jnp.float32)             # (HW, TN)
        S = (base * w00
             + pltpu.roll(base, 1, 0) * w01
             + pltpu.roll(base, W, 0) * w10
             + pltpu.roll(base, W + 1, 0) * w11)
    else:
        # Fallback: four independent int32 compares (pure VPU).
        S = ((iota == flat).astype(jnp.float32) * w00
             + (iota == flat + 1).astype(jnp.float32) * w01
             + (iota == flat + W).astype(jnp.float32) * w10
             + (iota == flat + W + 1).astype(jnp.float32) * w11)

    # --- MLP (first conv already folded into img1 in the wrapper) -------------
    # h = w1 @ grid_sample(img) + b1  ==  img1 @ S + b1
    # TODO(synk): for very large feature maps (HW >~ 4k) replace the one-hot
    # matmul with a per-point 4-row gather of img1 to avoid the (HW, TN) S tile.
    h = jnp.dot(img1_ref[0], S.astype(img1_ref.dtype),
                preferred_element_type=jnp.float32) + b1_ref[...]   # (C_hid, TN)
    h = jnp.maximum(h, 0.0)
    a = jnp.dot(w2_ref[...], h,
                preferred_element_type=jnp.float32) + b2_ref[...]   # (C_I, TN)

    # --- max over channels, sigmoid, gate pts_feats ---------------------------
    att = jax.nn.sigmoid(jnp.max(a, axis=0, keepdims=True))          # (1, TN)
    out_ref[0] = (att * feat_ref[0]).astype(out_ref.dtype)


def pointwise_gate7(pts_img, img_feats, pts_feats, w1, b1, w2, b2,
                    *, tile_n=512, matmul_dtype=jnp.bfloat16, use_roll=True):
    B, N, _ = pts_img.shape
    _, C_I, H, W = img_feats.shape
    _, C_P, _ = pts_feats.shape
    C_hid = w1.shape[0]
    HW = H * W

    # Fold the first 1x1 conv into the image (linear reassociation with the
    # bilinear sample): img1 = w1 @ img_flat, shape (B, C_hid, HW).
    img_flat = img_feats.reshape(B, C_I, HW).astype(jnp.float32)
    img1 = jnp.einsum('oc,bcp->bop', w1.astype(jnp.float32), img_flat,
                      precision=lax.Precision.HIGHEST).astype(matmul_dtype)

    pts_t = jnp.transpose(pts_img, (0, 2, 1)).astype(jnp.float32)    # (B, 2, N)
    b1_2d = b1.reshape(C_hid, 1).astype(jnp.float32)
    b2_2d = b2.reshape(C_I, 1).astype(jnp.float32)
    w2_f = w2.astype(jnp.float32)

    item = jnp.dtype(matmul_dtype).itemsize
    feat_item = jnp.dtype(pts_feats.dtype).itemsize

    # Lane-dense N tiling (multiple of 128).  Cap tile_n so the in-kernel
    # (HW, tile_n) intermediates (iota + base + S f32 + S cast) fit a fixed
    # VMEM budget even for large feature maps, then pad N if needed.
    s_budget = 12 << 20                                     # bytes
    bytes_per_col = HW * (4 + 4 + 4 + item)
    max_tile = max(128, (s_budget // max(bytes_per_col, 1)) // 128 * 128)
    tile_n = max(128, min(_round_up(tile_n, 128), max_tile, _round_up(N, 128)))
    n_pad = _round_up(N, tile_n)
    feats = pts_feats                           # keep native dtype (no upcast)
    if n_pad != N:
        pts_t = jnp.pad(pts_t, ((0, 0), (0, 0), (0, n_pad - N)))
        feats = jnp.pad(feats, ((0, 0), (0, 0), (0, n_pad - N)))
    n_tiles = n_pad // tile_n

    kernel = functools.partial(_gate_kernel, H=H, W=W, use_roll=use_roll)

    # Rough VMEM need: double-buffered blocks + in-kernel S/iota intermediates.
    est = (2 * (2 * tile_n * 4 + C_hid * HW * item
                + 2 * C_P * tile_n * feat_item
                + C_I * C_hid * 4 + (C_hid + C_I) * 4)
           + tile_n * bytes_per_col)
    vmem_limit = int(min(max(2 * est, 32 << 20), 56 << 20))   # v7x-safe cap

    out = pl.pallas_call(
        kernel,
        out_shape=jax.ShapeDtypeStruct((B, C_P, n_pad), pts_feats.dtype),
        grid_spec=pltpu.PrefetchScalarGridSpec(
            num_scalar_prefetch=0,
            grid=(B, n_tiles),
            in_specs=[
                pl.BlockSpec((1, 2, tile_n), lambda b, n: (b, 0, n)),
                pl.BlockSpec((1, C_hid, HW), lambda b, n: (b, 0, 0)),
                pl.BlockSpec((1, C_P, tile_n), lambda b, n: (b, 0, n)),
                pl.BlockSpec((C_hid, 1), lambda b, n: (0, 0)),
                pl.BlockSpec((C_I, C_hid), lambda b, n: (0, 0)),
                pl.BlockSpec((C_I, 1), lambda b, n: (0, 0)),
            ],
            out_specs=pl.BlockSpec((1, C_P, tile_n), lambda b, n: (b, 0, n)),
        ),
        compiler_params=pltpu.CompilerParams(
            dimension_semantics=("parallel", "parallel"),
            vmem_limit_bytes=vmem_limit),
    )(pts_t, img1, feats, b1_2d, w2_f, b2_2d)

    return out[:, :, :N] if n_pad != N else out


def ref_forward(pts_img, img_feats, pts_feats, w1, b1, w2, b2):
    """Pure-JAX f32 reference of the PyTorch forward (same grid_sample semantics)."""
    B, C_I, H, W = img_feats.shape
    gx = pts_img[..., 0]
    gy = pts_img[..., 1]
    ix = (gx + 1.0) * (W * 0.5) - 0.5
    iy = (gy + 1.0) * (H * 0.5) - 0.5
    x0 = jnp.floor(ix); y0 = jnp.floor(iy)
    x1 = x0 + 1.0;      y1 = y0 + 1.0
    wx1 = ix - x0; wx0 = 1.0 - wx1
    wy1 = iy - y0; wy0 = 1.0 - wy1
    img_flat = img_feats.reshape(B, C_I, H * W)

    def gather(y, x, w):
        valid = (x >= 0) & (x <= W - 1) & (y >= 0) & (y <= H - 1)
        xi = jnp.clip(x, 0, W - 1).astype(jnp.int32)
        yi = jnp.clip(y, 0, H - 1).astype(jnp.int32)
        flat = yi * W + xi                                       # (B, N)
        vals = jnp.take_along_axis(img_flat, flat[:, None, :], axis=2)
        return vals * (w * valid)[:, None, :]

    sampled = (gather(y0, x0, wy0 * wx0) + gather(y0, x1, wy0 * wx1)
               + gather(y1, x0, wy1 * wx0) + gather(y1, x1, wy1 * wx1))
    h = jnp.maximum(jnp.einsum('oc,bcn->bon', w1, sampled,
                               precision=lax.Precision.HIGHEST)
                    + b1[None, :, None], 0.0)
    a = jnp.einsum('oc,bcn->bon', w2, h,
                   precision=lax.Precision.HIGHEST) + b2[None, :, None]
    att = jax.nn.sigmoid(jnp.max(a, axis=1, keepdims=True))
    return att * pts_feats


if __name__ == "__main__":
    key = jax.random.PRNGKey(0)
    B, N, C_I, C_P, H, W = 2, 256, 16, 8, 16, 16
    reduction = 4                        # model_cfg.REDUCTION
    C_hid = C_I // reduction

    ks = jax.random.split(key, 7)
    pts_img = jax.random.uniform(ks[0], (B, N, 2), jnp.float32, -1.2, 1.2)
    img_feats = jax.random.normal(ks[1], (B, C_I, H, W), jnp.float32)
    pts_feats = jax.random.normal(ks[2], (B, C_P, N), jnp.float32)
    # Deterministic synthetic Conv1d (kernel_size=1) parameters.
    w1 = jax.random.normal(ks[3], (C_hid, C_I), jnp.float32) * 0.2
    b1 = jax.random.normal(ks[4], (C_hid,), jnp.float32) * 0.1
    w2 = jax.random.normal(ks[5], (C_I, C_hid), jnp.float32) * 0.2
    b2 = jax.random.normal(ks[6], (C_I,), jnp.float32) * 0.1

    ref = ref_forward(pts_img, img_feats, pts_feats, w1, b1, w2, b2)

    def run_and_check(use_roll):
        # Exact structural check: f32 MXU operands, tight tolerance.
        out_f32 = pointwise_gate7(pts_img, img_feats, pts_feats, w1, b1, w2, b2,
                                  tile_n=128, matmul_dtype=jnp.float32,
                                  use_roll=use_roll)
        out_f32 = jax.block_until_ready(out_f32)
        assert out_f32.shape == (B, C_P, N)
        assert jnp.allclose(out_f32, ref, atol=1e-4, rtol=1e-4), float(
            jnp.max(jnp.abs(out_f32 - ref)))
        # Fast path: bf16 MXU operands (default), looser tolerance.
        out_bf16 = pointwise_gate7(pts_img, img_feats, pts_feats, w1, b1, w2, b2,
                                   tile_n=128, use_roll=use_roll)
        out_bf16 = jax.block_until_ready(out_bf16)
        assert out_bf16.shape == (B, C_P, N)
        assert jnp.allclose(out_bf16, ref, atol=5e-2, rtol=5e-2), float(
            jnp.max(jnp.abs(out_bf16 - ref)))

    try:
        run_and_check(use_roll=True)
    except AssertionError:
        raise
    except Exception:
        # Sublane pltpu.roll unsupported on this toolchain: fall back to the
        # 4-compare S construction (identical semantics, VPU-only).
        run_and_check(use_roll=False)

    print("KERNEL_OK")
</pallas_src>

<mosaic_0001>
module attributes {stable_mosaic.version = 11 : i64} {
  func.func @_gate_kernel(%arg0: i32, %arg1: i32, %arg2: memref<1x2x128xf32, #tpu.memory_space<vmem>>, %arg3: memref<1x4x256xf32, #tpu.memory_space<vmem>>, %arg4: memref<1x8x128xf32, #tpu.memory_space<vmem>>, %arg5: memref<4x1xf32, #tpu.memory_space<vmem>>, %arg6: memref<16x4xf32, #tpu.memory_space<vmem>>, %arg7: memref<16x1xf32, #tpu.memory_space<vmem>>, %arg8: memref<1x8x128xf32, #tpu.memory_space<vmem>>) attributes {dimension_semantics = [#tpu.dimension_semantics<parallel>, #tpu.dimension_semantics<parallel>], iteration_bounds = array<i64: 2, 2>, scalar_prefetch = 0 : i64, scratch_operands = 0 : i64, tpu.core_type = #tpu.core_type<tc>, window_params = [{transform_indices = @transform_0, window_bounds = array<i64: 1, 2, 128>}, {transform_indices = @transform_1, window_bounds = array<i64: 1, 4, 256>}, {transform_indices = @transform_2, window_bounds = array<i64: 1, 8, 128>}, {pipeline_mode = #tpu.pipeline_mode<synchronous>, transform_indices = @transform_3, window_bounds = array<i64: 4, 1>}, {pipeline_mode = #tpu.pipeline_mode<synchronous>, transform_indices = @transform_4, window_bounds = array<i64: 16, 4>}, {pipeline_mode = #tpu.pipeline_mode<synchronous>, transform_indices = @transform_5, window_bounds = array<i64: 16, 1>}, {transform_indices = @transform_6, window_bounds = array<i64: 1, 8, 128>}]} {
    %c0 = arith.constant 0 : index
    %c0_0 = arith.constant 0 : index
    %c0_1 = arith.constant 0 : index
    %0 = vector.load %arg2[%c0, %c0_0, %c0_1] : memref<1x2x128xf32, #tpu.memory_space<vmem>>, vector<1x2x128xf32>
    %1 = vector.shape_cast %0 : vector<1x2x128xf32> to vector<2x128xf32>
    %2 = vector.extract_strided_slice %1 {offsets = [0, 0], sizes = [1, 128], strides = [1, 1]} : vector<2x128xf32> to vector<1x128xf32>
    %3 = vector.extract_strided_slice %1 {offsets = [1, 0], sizes = [1, 128], strides = [1, 1]} : vector<2x128xf32> to vector<1x128xf32>
    %cst = arith.constant 1.000000e+00 : f32
    %4 = vector.broadcast %cst : f32 to vector<1x128xf32>
    %5 = arith.addf %2, %4 : vector<1x128xf32>
    %cst_2 = arith.constant 8.000000e+00 : f32
    %6 = vector.broadcast %cst_2 : f32 to vector<1x128xf32>
    %7 = arith.mulf %5, %6 : vector<1x128xf32>
    %cst_3 = arith.constant 5.000000e-01 : f32
    %8 = vector.broadcast %cst_3 : f32 to vector<1x128xf32>
    %9 = arith.subf %7, %8 : vector<1x128xf32>
    %cst_4 = arith.constant 1.000000e+00 : f32
    %10 = vector.broadcast %cst_4 : f32 to vector<1x128xf32>
    %11 = arith.addf %3, %10 : vector<1x128xf32>
    %cst_5 = arith.constant 8.000000e+00 : f32
    %12 = vector.broadcast %cst_5 : f32 to vector<1x128xf32>
    %13 = arith.mulf %11, %12 : vector<1x128xf32>
    %cst_6 = arith.constant 5.000000e-01 : f32
    %14 = vector.broadcast %cst_6 : f32 to vector<1x128xf32>
    %15 = arith.subf %13, %14 : vector<1x128xf32>
    %16 = math.floor %9 : vector<1x128xf32>
    %17 = math.floor %15 : vector<1x128xf32>
    %18 = arith.subf %9, %16 : vector<1x128xf32>
    %cst_7 = arith.constant 1.000000e+00 : f32
    %19 = vector.broadcast %cst_7 : f32 to vector<1x128xf32>
    %20 = arith.subf %19, %18 : vector<1x128xf32>
    %21 = arith.subf %15, %17 : vector<1x128xf32>
    %cst_8 = arith.constant 1.000000e+00 : f32
    %22 = vector.broadcast %cst_8 : f32 to vector<1x128xf32>
    %23 = arith.subf %22, %21 : vector<1x128xf32>
    %24 = arith.fptosi %16 : vector<1x128xf32> to vector<1x128xi32>
    %25 = arith.fptosi %17 : vector<1x128xf32> to vector<1x128xi32>
    %c0_i32 = arith.constant 0 : i32
    %26 = vector.broadcast %c0_i32 : i32 to vector<1x128xi32>
    %27 = arith.cmpi sge, %24, %26 : vector<1x128xi32>
    %c15_i32 = arith.constant 15 : i32
    %28 = vector.broadcast %c15_i32 : i32 to vector<1x128xi32>
    %29 = arith.cmpi sle, %24, %28 : vector<1x128xi32>
    %30 = arith.andi %27, %29 : vector<1x128xi1>
    %cst_9 = arith.constant 0.000000e+00 : f32
    %31 = vector.broadcast %cst_9 : f32 to vector<1x128xf32>
    %32 = arith.select %30, %20, %31 : vector<1x128xi1>, vector<1x128xf32>
    %c-1_i32 = arith.constant -1 : i32
    %33 = vector.broadcast %c-1_i32 : i32 to vector<1x128xi32>
    %34 = arith.cmpi sge, %24, %33 : vector<1x128xi32>
    %c14_i32 = arith.constant 14 : i32
    %35 = vector.broadcast %c14_i32 : i32 to vector<1x128xi32>
    %36 = arith.cmpi sle, %24, %35 : vector<1x128xi32>
    %37 = arith.andi %34, %36 : vector<1x128xi1>
    %cst_10 = arith.constant 0.000000e+00 : f32
    %38 = vector.broadcast %cst_10 : f32 to vector<1x128xf32>
    %39 = arith.select %37, %18, %38 : vector<1x128xi1>, vector<1x128xf32>
    %c0_i32_11 = arith.constant 0 : i32
    %40 = vector.broadcast %c0_i32_11 : i32 to vector<1x128xi32>
    %41 = arith.cmpi sge, %25, %40 : vector<1x128xi32>
    %c15_i32_12 = arith.constant 15 : i32
    %42 = vector.broadcast %c15_i32_12 : i32 to vector<1x128xi32>
    %43 = arith.cmpi sle, %25, %42 : vector<1x128xi32>
    %44 = arith.andi %41, %43 : vector<1x128xi1>
    %cst_13 = arith.constant 0.000000e+00 : f32
    %45 = vector.broadcast %cst_13 : f32 to vector<1x128xf32>
    %46 = arith.select %44, %23, %45 : vector<1x128xi1>, vector<1x128xf32>
    %c-1_i32_14 = arith.constant -1 : i32
    %47 = vector.broadcast %c-1_i32_14 : i32 to vector<1x128xi32>
    %48 = arith.cmpi sge, %25, %47 : vector<1x128xi32>
    %c14_i32_15 = arith.constant 14 : i32
    %49 = vector.broadcast %c14_i32_15 : i32 to vector<1x128xi32>
    %50 = arith.cmpi sle, %25, %49 : vector<1x128xi32>
    %51 = arith.andi %48, %50 : vector<1x128xi1>
    %cst_16 = arith.constant 0.000000e+00 : f32
    %52 = vector.broadcast %cst_16 : f32 to vector<1x128xf32>
    %53 = arith.select %51, %21, %52 : vector<1x128xi1>, vector<1x128xf32>
    %54 = arith.mulf %46, %32 : vector<1x128xf32>
    %55 = arith.mulf %46, %39 : vector<1x128xf32>
    %56 = arith.mulf %53, %32 : vector<1x128xf32>
    %57 = arith.mulf %53, %39 : vector<1x128xf32>
    %c16_i32 = arith.constant 16 : i32
    %58 = vector.broadcast %c16_i32 : i32 to vector<1x128xi32>
    %59 = arith.muli %25, %58 : vector<1x128xi32>
    %60 = arith.addi %59, %24 : vector<1x128xi32>
    %61 = tpu.iota {dimensions = array<i32: 0>} : vector<256x128xi32>
    %c256_i32 = arith.constant 256 : i32
    %c0_i32_17 = arith.constant 0 : i32
    %62 = arith.cmpi eq, %c256_i32, %c0_i32_17 : i32
    %c1_i32 = arith.constant 1 : i32
    %63 = arith.select %62, %c1_i32, %c256_i32 : i32
    %64 = vector.broadcast %63 : i32 to vector<1x128xi32>
    %65 = arith.remsi %60, %64 : vector<1x128xi32>
    %c0_i32_18 = arith.constant 0 : i32
    %66 = vector.broadcast %c0_i32_18 : i32 to vector<1x128xi32>
    %67 = arith.cmpi ne, %65, %66 : vector<1x128xi32>
    %c0_i32_19 = arith.constant 0 : i32
    %68 = vector.broadcast %c0_i32_19 : i32 to vector<1x128xi32>
    %69 = arith.cmpi slt, %65, %68 : vector<1x128xi32>
    %c0_i32_20 = arith.constant 0 : i32
    %70 = arith.cmpi slt, %63, %c0_i32_20 : i32
    %71 = vector.broadcast %70 : i1 to vector<1x128xi1>
    %72 = vector.broadcast %71 : vector<1x128xi1> to vector<1x128xi1>
    %73 = arith.xori %69, %72 : vector<1x128xi1>
    %74 = arith.andi %73, %67 : vector<1x128xi1>
    %75 = vector.broadcast %63 : i32 to vector<1x128xi32>
    %76 = arith.addi %65, %75 : vector<1x128xi32>
    %77 = arith.select %74, %76, %65 : vector<1x128xi1>, vector<1x128xi32>
    %78 = vector.broadcast %77 : vector<1x128xi32> to vector<256x128xi32>
    %79 = arith.cmpi eq, %61, %78 : vector<256x128xi32>
    %80 = arith.extui %79 : vector<256x128xi1> to vector<256x128xi32>
    %81 = arith.sitofp %80 : vector<256x128xi32> to vector<256x128xf32>
    %82 = vector.broadcast %54 : vector<1x128xf32> to vector<256x128xf32>
    %83 = arith.mulf %81, %82 : vector<256x128xf32>
    %c1_i32_21 = arith.constant 1 : i32
    %84 = tpu.dynamic_rotate %81 by %c1_i32_21 dim 0 : vector<256x128xf32>, i32 -> vector<256x128xf32>
    %85 = vector.broadcast %55 : vector<1x128xf32> to vector<256x128xf32>
    %86 = arith.mulf %84, %85 : vector<256x128xf32>
    %87 = arith.addf %83, %86 : vector<256x128xf32>
    %c16_i32_22 = arith.constant 16 : i32
    %88 = tpu.dynamic_rotate %81 by %c16_i32_22 dim 0 : vector<256x128xf32>, i32 -> vector<256x128xf32>
    %89 = vector.broadcast %56 : vector<1x128xf32> to vector<256x128xf32>
    %90 = arith.mulf %88, %89 : vector<256x128xf32>
    %91 = arith.addf %87, %90 : vector<256x128xf32>
    %c17_i32 = arith.constant 17 : i32
    %92 = tpu.dynamic_rotate %81 by %c17_i32 dim 0 : vector<256x128xf32>, i32 -> vector<256x128xf32>
    %93 = vector.broadcast %57 : vector<1x128xf32> to vector<256x128xf32>
    %94 = arith.mulf %92, %93 : vector<256x128xf32>
    %95 = arith.addf %91, %94 : vector<256x128xf32>
    %c0_23 = arith.constant 0 : index
    %c0_24 = arith.constant 0 : index
    %c0_25 = arith.constant 0 : index
    %96 = vector.load %arg3[%c0_23, %c0_24, %c0_25] : memref<1x4x256xf32, #tpu.memory_space<vmem>>, vector<1x4x256xf32>
    %97 = vector.shape_cast %96 : vector<1x4x256xf32> to vector<4x256xf32>
    %cst_26 = arith.constant dense<0.000000e+00> : vector<4x128xf32>
    %98 = tpu.matmul %97, %95, %cst_26 {dimension_numbers = #tpu.dot_dimension_numbers<[1], [0], [0], [1], [0, 0, 1, 1], [], []>} : vector<4x256xf32>, vector<256x128xf32>, vector<4x128xf32> -> vector<4x128xf32>
    %c0_27 = arith.constant 0 : index
    %c0_28 = arith.constant 0 : index
    %99 = vector.load %arg5[%c0_27, %c0_28] : memref<4x1xf32, #tpu.memory_space<vmem>>, vector<4x1xf32>
    %100 = vector.broadcast %99 : vector<4x1xf32> to vector<4x128xf32>
    %101 = arith.addf %98, %100 : vector<4x128xf32>
    %cst_29 = arith.constant 0.000000e+00 : f32
    %102 = vector.broadcast %cst_29 : f32 to vector<4x128xf32>
    %103 = arith.maximumf %101, %102 : vector<4x128xf32>
    %c0_30 = arith.constant 0 : index
    %c0_31 = arith.constant 0 : index
    %104 = vector.load %arg6[%c0_30, %c0_31] : memref<16x4xf32, #tpu.memory_space<vmem>>, vector<16x4xf32>
    %cst_32 = arith.constant dense<0.000000e+00> : vector<16x128xf32>
    %105 = tpu.matmul %104, %103, %cst_32 {dimension_numbers = #tpu.dot_dimension_numbers<[1], [0], [0], [1], [0, 0, 1, 1], [], []>} : vector<16x4xf32>, vector<4x128xf32>, vector<16x128xf32> -> vector<16x128xf32>
    %c0_33 = arith.constant 0 : index
    %c0_34 = arith.constant 0 : index
    %106 = vector.load %arg7[%c0_33, %c0_34] : memref<16x1xf32, #tpu.memory_space<vmem>>, vector<16x1xf32>
    %107 = vector.broadcast %106 : vector<16x1xf32> to vector<16x128xf32>
    %108 = arith.addf %105, %107 : vector<16x128xf32>
    %cst_35 = arith.constant dense<0xFF800000> : vector<128xf32>
    %109 = vector.multi_reduction <maximumf>, %108, %cst_35 [0] : vector<16x128xf32> to vector<128xf32>
    %110 = vector.shape_cast %109 : vector<128xf32> to vector<1x128xf32>
    %111 = arith.negf %110 : vector<1x128xf32>
    %112 = math.exp %111 : vector<1x128xf32>
    %cst_36 = arith.constant 1.000000e+00 : f32
    %113 = vector.broadcast %cst_36 : f32 to vector<1x128xf32>
    %114 = arith.addf %113, %112 : vector<1x128xf32>
    %115 = arith.divf %113, %114 : vector<1x128xf32>
    %c0_37 = arith.constant 0 : index
    %c0_38 = arith.constant 0 : index
    %c0_39 = arith.constant 0 : index
    %116 = vector.load %arg4[%c0_37, %c0_38, %c0_39] : memref<1x8x128xf32, #tpu.memory_space<vmem>>, vector<1x8x128xf32>
    %117 = vector.shape_cast %116 : vector<1x8x128xf32> to vector<8x128xf32>
    %118 = vector.broadcast %115 : vector<1x128xf32> to vector<8x128xf32>
    %119 = arith.mulf %118, %117 : vector<8x128xf32>
    %c0_40 = arith.constant 0 : index
    %c0_41 = arith.constant 0 : index
    %c0_42 = arith.constant 0 : index
    %120 = vector.load %arg8[%c0_40, %c0_41, %c0_42] : memref<1x8x128xf32, #tpu.memory_space<vmem>>, vector<1x8x128xf32>
    %121 = vector.shape_cast %120 : vector<1x8x128xf32> to vector<8x128xf32>
    %122 = vector.shape_cast %119 : vector<8x128xf32> to vector<1x8x128xf32>
    tpu.vector_store %arg8[%c0_40, %c0_41, %c0_42], %122 {strides = array<i32>} : memref<1x8x128xf32, #tpu.memory_space<vmem>>, vector<1x8x128xf32>,
    return
  }
  func.func @transform_0(%arg0: i32, %arg1: i32) -> (i32, i32, i32) {
    %c0_i32 = arith.constant 0 : i32
    %c0_i32_0 = arith.constant 0 : i32
    return %arg0, %c0_i32, %arg1 : i32, i32, i32
  }
  func.func @transform_1(%arg0: i32, %arg1: i32) -> (i32, i32, i32) {
    %c0_i32 = arith.constant 0 : i32
    %c0_i32_0 = arith.constant 0 : i32
    %c0_i32_1 = arith.constant 0 : i32
    return %arg0, %c0_i32, %c0_i32_0 : i32, i32, i32
  }
  func.func @transform_2(%arg0: i32, %arg1: i32) -> (i32, i32, i32) {
    %c0_i32 = arith.constant 0 : i32
    %c0_i32_0 = arith.constant 0 : i32
    return %arg0, %c0_i32, %arg1 : i32, i32, i32
  }
  func.func @transform_3(%arg0: i32, %arg1: i32) -> (i32, i32) {
    %c0_i32 = arith.constant 0 : i32
    %c0_i32_0 = arith.constant 0 : i32
    %c0_i32_1 = arith.constant 0 : i32
    return %c0_i32, %c0_i32_0 : i32, i32
  }
  func.func @transform_4(%arg0: i32, %arg1: i32) -> (i32, i32) {
    %c0_i32 = arith.constant 0 : i32
    %c0_i32_0 = arith.constant 0 : i32
    %c0_i32_1 = arith.constant 0 : i32
    return %c0_i32, %c0_i32_0 : i32, i32
  }
  func.func @transform_5(%arg0: i32, %arg1: i32) -> (i32, i32) {
    %c0_i32 = arith.constant 0 : i32
    %c0_i32_0 = arith.constant 0 : i32
    %c0_i32_1 = arith.constant 0 : i32
    return %c0_i32, %c0_i32_0 : i32, i32
  }
  func.func @transform_6(%arg0: i32, %arg1: i32) -> (i32, i32, i32) {
    %c0_i32 = arith.constant 0 : i32
    %c0_i32_0 = arith.constant 0 : i32
    return %arg0, %c0_i32, %arg1 : i32, i32, i32
  }
}

module attributes {stable_mosaic.version = 11 : i64} {
  func.func @_gate_kernel(%arg0: i32, %arg1: i32, %arg2: memref<1x2x128xf32, #tpu.memory_space<vmem>>, %arg3: memref<1x4x256xf32, #tpu.memory_space<vmem>>, %arg4: memref<1x8x128xf32, #tpu.memory_space<vmem>>, %arg5: memref<4x1xf32, #tpu.memory_space<vmem>>, %arg6: memref<16x4xf32, #tpu.memory_space<vmem>>, %arg7: memref<16x1xf32, #tpu.memory_space<vmem>>, %arg8: memref<1x8x128xf32, #tpu.memory_space<vmem>>) attributes {dimension_semantics = [#tpu.dimension_semantics<parallel>, #tpu.dimension_semantics<parallel>], iteration_bounds = array<i64: 2, 2>, scalar_prefetch = 0 : i64, scratch_operands = 0 : i64, tpu.core_type = #tpu.core_type<tc>, window_params = [{transform_indices = @transform_0, window_bounds = array<i64: 1, 2, 128>}, {transform_indices = @transform_1, window_bounds = array<i64: 1, 4, 256>}, {transform_indices = @transform_2, window_bounds = array<i64: 1, 8, 128>}, {pipeline_mode = #tpu.pipeline_mode<synchronous>, transform_indices = @transform_3, window_bounds = array<i64: 4, 1>}, {pipeline_mode = #tpu.pipeline_mode<synchronous>, transform_indices = @transform_4, window_bounds = array<i64: 16, 4>}, {pipeline_mode = #tpu.pipeline_mode<synchronous>, transform_indices = @transform_5, window_bounds = array<i64: 16, 1>}, {transform_indices = @transform_6, window_bounds = array<i64: 1, 8, 128>}]} {
    %c0 = arith.constant 0 : index
    %c0_0 = arith.constant 0 : index
    %c0_1 = arith.constant 0 : index
    %0 = vector.load %arg2[%c0, %c0_0, %c0_1] : memref<1x2x128xf32, #tpu.memory_space<vmem>>, vector<1x2x128xf32>
    %1 = vector.shape_cast %0 : vector<1x2x128xf32> to vector<2x128xf32>
    %2 = vector.extract_strided_slice %1 {offsets = [0, 0], sizes = [1, 128], strides = [1, 1]} : vector<2x128xf32> to vector<1x128xf32>
    %3 = vector.extract_strided_slice %1 {offsets = [1, 0], sizes = [1, 128], strides = [1, 1]} : vector<2x128xf32> to vector<1x128xf32>
    %cst = arith.constant 1.000000e+00 : f32
    %4 = vector.broadcast %cst : f32 to vector<1x128xf32>
    %5 = arith.addf %2, %4 : vector<1x128xf32>
    %cst_2 = arith.constant 8.000000e+00 : f32
    %6 = vector.broadcast %cst_2 : f32 to vector<1x128xf32>
    %7 = arith.mulf %5, %6 : vector<1x128xf32>
    %cst_3 = arith.constant 5.000000e-01 : f32
    %8 = vector.broadcast %cst_3 : f32 to vector<1x128xf32>
    %9 = arith.subf %7, %8 : vector<1x128xf32>
    %cst_4 = arith.constant 1.000000e+00 : f32
    %10 = vector.broadcast %cst_4 : f32 to vector<1x128xf32>
    %11 = arith.addf %3, %10 : vector<1x128xf32>
    %cst_5 = arith.constant 8.000000e+00 : f32
    %12 = vector.broadcast %cst_5 : f32 to vector<1x128xf32>
    %13 = arith.mulf %11, %12 : vector<1x128xf32>
    %cst_6 = arith.constant 5.000000e-01 : f32
    %14 = vector.broadcast %cst_6 : f32 to vector<1x128xf32>
    %15 = arith.subf %13, %14 : vector<1x128xf32>
    %16 = math.floor %9 : vector<1x128xf32>
    %17 = math.floor %15 : vector<1x128xf32>
    %18 = arith.subf %9, %16 : vector<1x128xf32>
    %cst_7 = arith.constant 1.000000e+00 : f32
    %19 = vector.broadcast %cst_7 : f32 to vector<1x128xf32>
    %20 = arith.subf %19, %18 : vector<1x128xf32>
    %21 = arith.subf %15, %17 : vector<1x128xf32>
    %cst_8 = arith.constant 1.000000e+00 : f32
    %22 = vector.broadcast %cst_8 : f32 to vector<1x128xf32>
    %23 = arith.subf %22, %21 : vector<1x128xf32>
    %24 = arith.fptosi %16 : vector<1x128xf32> to vector<1x128xi32>
    %25 = arith.fptosi %17 : vector<1x128xf32> to vector<1x128xi32>
    %c0_i32 = arith.constant 0 : i32
    %26 = vector.broadcast %c0_i32 : i32 to vector<1x128xi32>
    %27 = arith.cmpi sge, %24, %26 : vector<1x128xi32>
    %c15_i32 = arith.constant 15 : i32
    %28 = vector.broadcast %c15_i32 : i32 to vector<1x128xi32>
    %29 = arith.cmpi sle, %24, %28 : vector<1x128xi32>
    %30 = arith.andi %27, %29 : vector<1x128xi1>
    %cst_9 = arith.constant 0.000000e+00 : f32
    %31 = vector.broadcast %cst_9 : f32 to vector<1x128xf32>
    %32 = arith.select %30, %20, %31 : vector<1x128xi1>, vector<1x128xf32>
    %c-1_i32 = arith.constant -1 : i32
    %33 = vector.broadcast %c-1_i32 : i32 to vector<1x128xi32>
    %34 = arith.cmpi sge, %24, %33 : vector<1x128xi32>
    %c14_i32 = arith.constant 14 : i32
    %35 = vector.broadcast %c14_i32 : i32 to vector<1x128xi32>
    %36 = arith.cmpi sle, %24, %35 : vector<1x128xi32>
    %37 = arith.andi %34, %36 : vector<1x128xi1>
    %cst_10 = arith.constant 0.000000e+00 : f32
    %38 = vector.broadcast %cst_10 : f32 to vector<1x128xf32>
    %39 = arith.select %37, %18, %38 : vector<1x128xi1>, vector<1x128xf32>
    %c0_i32_11 = arith.constant 0 : i32
    %40 = vector.broadcast %c0_i32_11 : i32 to vector<1x128xi32>
    %41 = arith.cmpi sge, %25, %40 : vector<1x128xi32>
    %c15_i32_12 = arith.constant 15 : i32
    %42 = vector.broadcast %c15_i32_12 : i32 to vector<1x128xi32>
    %43 = arith.cmpi sle, %25, %42 : vector<1x128xi32>
    %44 = arith.andi %41, %43 : vector<1x128xi1>
    %cst_13 = arith.constant 0.000000e+00 : f32
    %45 = vector.broadcast %cst_13 : f32 to vector<1x128xf32>
    %46 = arith.select %44, %23, %45 : vector<1x128xi1>, vector<1x128xf32>
    %c-1_i32_14 = arith.constant -1 : i32
    %47 = vector.broadcast %c-1_i32_14 : i32 to vector<1x128xi32>
    %48 = arith.cmpi sge, %25, %47 : vector<1x128xi32>
    %c14_i32_15 = arith.constant 14 : i32
    %49 = vector.broadcast %c14_i32_15 : i32 to vector<1x128xi32>
    %50 = arith.cmpi sle, %25, %49 : vector<1x128xi32>
    %51 = arith.andi %48, %50 : vector<1x128xi1>
    %cst_16 = arith.constant 0.000000e+00 : f32
    %52 = vector.broadcast %cst_16 : f32 to vector<1x128xf32>
    %53 = arith.select %51, %21, %52 : vector<1x128xi1>, vector<1x128xf32>
    %54 = arith.mulf %46, %32 : vector<1x128xf32>
    %55 = arith.mulf %46, %39 : vector<1x128xf32>
    %56 = arith.mulf %53, %32 : vector<1x128xf32>
    %57 = arith.mulf %53, %39 : vector<1x128xf32>
    %c16_i32 = arith.constant 16 : i32
    %58 = vector.broadcast %c16_i32 : i32 to vector<1x128xi32>
    %59 = arith.muli %25, %58 : vector<1x128xi32>
    %60 = arith.addi %59, %24 : vector<1x128xi32>
    %61 = tpu.iota {dimensions = array<i32: 0>} : vector<256x128xi32>
    %62 = vector.broadcast %60 : vector<1x128xi32> to vector<256x128xi32>
    %63 = arith.cmpi eq, %61, %62 : vector<256x128xi32>
    %64 = arith.extui %63 : vector<256x128xi1> to vector<256x128xi32>
    %65 = arith.sitofp %64 : vector<256x128xi32> to vector<256x128xf32>
    %66 = vector.broadcast %54 : vector<1x128xf32> to vector<256x128xf32>
    %67 = arith.mulf %65, %66 : vector<256x128xf32>
    %c1_i32 = arith.constant 1 : i32
    %68 = vector.broadcast %c1_i32 : i32 to vector<1x128xi32>
    %69 = arith.addi %60, %68 : vector<1x128xi32>
    %70 = vector.broadcast %69 : vector<1x128xi32> to vector<256x128xi32>
    %71 = arith.cmpi eq, %61, %70 : vector<256x128xi32>
    %72 = arith.extui %71 : vector<256x128xi1> to vector<256x128xi32>
    %73 = arith.sitofp %72 : vector<256x128xi32> to vector<256x128xf32>
    %74 = vector.broadcast %55 : vector<1x128xf32> to vector<256x128xf32>
    %75 = arith.mulf %73, %74 : vector<256x128xf32>
    %76 = arith.addf %67, %75 : vector<256x128xf32>
    %c16_i32_17 = arith.constant 16 : i32
    %77 = vector.broadcast %c16_i32_17 : i32 to vector<1x128xi32>
    %78 = arith.addi %60, %77 : vector<1x128xi32>
    %79 = vector.broadcast %78 : vector<1x128xi32> to vector<256x128xi32>
    %80 = arith.cmpi eq, %61, %79 : vector<256x128xi32>
    %81 = arith.extui %80 : vector<256x128xi1> to vector<256x128xi32>
    %82 = arith.sitofp %81 : vector<256x128xi32> to vector<256x128xf32>
    %83 = vector.broadcast %56 : vector<1x128xf32> to vector<256x128xf32>
    %84 = arith.mulf %82, %83 : vector<256x128xf32>
    %85 = arith.addf %76, %84 : vector<256x128xf32>
    %c16_i32_18 = arith.constant 16 : i32
    %86 = vector.broadcast %c16_i32_18 : i32 to vector<1x128xi32>
    %87 = arith.addi %60, %86 : vector<1x128xi32>
    %c1_i32_19 = arith.constant 1 : i32
    %88 = vector.broadcast %c1_i32_19 : i32 to vector<1x128xi32>
    %89 = arith.addi %87, %88 : vector<1x128xi32>
    %90 = vector.broadcast %89 : vector<1x128xi32> to vector<256x128xi32>
    %91 = arith.cmpi eq, %61, %90 : vector<256x128xi32>
    %92 = arith.extui %91 : vector<256x128xi1> to vector<256x128xi32>
    %93 = arith.sitofp %92 : vector<256x128xi32> to vector<256x128xf32>
    %94 = vector.broadcast %57 : vector<1x128xf32> to vector<256x128xf32>
    %95 = arith.mulf %93, %94 : vector<256x128xf32>
    %96 = arith.addf %85, %95 : vector<256x128xf32>
    %c0_20 = arith.constant 0 : index
    %c0_21 = arith.constant 0 : index
    %c0_22 = arith.constant 0 : index
    %97 = vector.load %arg3[%c0_20, %c0_21, %c0_22] : memref<1x4x256xf32, #tpu.memory_space<vmem>>, vector<1x4x256xf32>
    %98 = vector.shape_cast %97 : vector<1x4x256xf32> to vector<4x256xf32>
    %cst_23 = arith.constant dense<0.000000e+00> : vector<4x128xf32>
    %99 = tpu.matmul %98, %96, %cst_23 {dimension_numbers = #tpu.dot_dimension_numbers<[1], [0], [0], [1], [0, 0, 1, 1], [], []>} : vector<4x256xf32>, vector<256x128xf32>, vector<4x128xf32> -> vector<4x128xf32>
    %c0_24 = arith.constant 0 : index
    %c0_25 = arith.constant 0 : index
    %100 = vector.load %arg5[%c0_24, %c0_25] : memref<4x1xf32, #tpu.memory_space<vmem>>, vector<4x1xf32>
    %101 = vector.broadcast %100 : vector<4x1xf32> to vector<4x128xf32>
    %102 = arith.addf %99, %101 : vector<4x128xf32>
    %cst_26 = arith.constant 0.000000e+00 : f32
    %103 = vector.broadcast %cst_26 : f32 to vector<4x128xf32>
    %104 = arith.maximumf %102, %103 : vector<4x128xf32>
    %c0_27 = arith.constant 0 : index
    %c0_28 = arith.constant 0 : index
    %105 = vector.load %arg6[%c0_27, %c0_28] : memref<16x4xf32, #tpu.memory_space<vmem>>, vector<16x4xf32>
    %cst_29 = arith.constant dense<0.000000e+00> : vector<16x128xf32>
    %106 = tpu.matmul %105, %104, %cst_29 {dimension_numbers = #tpu.dot_dimension_numbers<[1], [0], [0], [1], [0, 0, 1, 1], [], []>} : vector<16x4xf32>, vector<4x128xf32>, vector<16x128xf32> -> vector<16x128xf32>
    %c0_30 = arith.constant 0 : index
    %c0_31 = arith.constant 0 : index
    %107 = vector.load %arg7[%c0_30, %c0_31] : memref<16x1xf32, #tpu.memory_space<vmem>>, vector<16x1xf32>
    %108 = vector.broadcast %107 : vector<16x1xf32> to vector<16x128xf32>
    %109 = arith.addf %106, %108 : vector<16x128xf32>
    %cst_32 = arith.constant dense<0xFF800000> : vector<128xf32>
    %110 = vector.multi_reduction <maximumf>, %109, %cst_32 [0] : vector<16x128xf32> to vector<128xf32>
    %111 = vector.shape_cast %110 : vector<128xf32> to vector<1x128xf32>
    %112 = arith.negf %111 : vector<1x128xf32>
    %113 = math.exp %112 : vector<1x128xf32>
    %cst_33 = arith.constant 1.000000e+00 : f32
    %114 = vector.broadcast %cst_33 : f32 to vector<1x128xf32>
    %115 = arith.addf %114, %113 : vector<1x128xf32>
    %116 = arith.divf %114, %115 : vector<1x128xf32>
    %c0_34 = arith.constant 0 : index
    %c0_35 = arith.constant 0 : index
    %c0_36 = arith.constant 0 : index
    %117 = vector.load %arg4[%c0_34, %c0_35, %c0_36] : memref<1x8x128xf32, #tpu.memory_space<vmem>>, vector<1x8x128xf32>
    %118 = vector.shape_cast %117 : vector<1x8x128xf32> to vector<8x128xf32>
    %119 = vector.broadcast %116 : vector<1x128xf32> to vector<8x128xf32>
    %120 = arith.mulf %119, %118 : vector<8x128xf32>
    %c0_37 = arith.constant 0 : index
    %c0_38 = arith.constant 0 : index
    %c0_39 = arith.constant 0 : index
    %121 = vector.load %arg8[%c0_37, %c0_38, %c0_39] : memref<1x8x128xf32, #tpu.memory_space<vmem>>, vector<1x8x128xf32>
    %122 = vector.shape_cast %121 : vector<1x8x128xf32> to vector<8x128xf32>
    %123 = vector.shape_cast %120 : vector<8x128xf32> to vector<1x8x128xf32>
    tpu.vector_store %arg8[%c0_37, %c0_38, %c0_39], %123 {strides = array<i32>} : memref<1x8x128xf32, #tpu.memory_space<vmem>>, vector<1x8x128xf32>,
    return
  }
  func.func @transform_0(%arg0: i32, %arg1: i32) -> (i32, i32, i32) {
    %c0_i32 = arith.constant 0 : i32
    %c0_i32_0 = arith.constant 0 : i32
    return %arg0, %c0_i32, %arg1 : i32, i32, i32
  }
  func.func @transform_1(%arg0: i32, %arg1: i32) -> (i32, i32, i32) {
    %c0_i32 = arith.constant 0 : i32
    %c0_i32_0 = arith.constant 0 : i32
    %c0_i32_1 = arith.constant 0 : i32
    return %arg0, %c0_i32, %c0_i32_0 : i32, i32, i32
  }
  func.func @transform_2(%arg0: i32, %arg1: i32) -> (i32, i32, i32) {
    %c0_i32 = arith.constant 0 : i32
    %c0_i32_0 = arith.constant 0 : i32
    return %arg0, %c0_i32, %arg1 : i32, i32, i32
  }
  func.func @transform_3(%arg0: i32, %arg1: i32) -> (i32, i32) {
    %c0_i32 = arith.constant 0 : i32
    %c0_i32_0 = arith.constant 0 : i32
    %c0_i32_1 = arith.constant 0 : i32
    return %c0_i32, %c0_i32_0 : i32, i32
  }
  func.func @transform_4(%arg0: i32, %arg1: i32) -> (i32, i32) {
    %c0_i32 = arith.constant 0 : i32
    %c0_i32_0 = arith.constant 0 : i32
    %c0_i32_1 = arith.constant 0 : i32
    return %c0_i32, %c0_i32_0 : i32, i32
  }
  func.func @transform_5(%arg0: i32, %arg1: i32) -> (i32, i32) {
    %c0_i32 = arith.constant 0 : i32
    %c0_i32_0 = arith.constant 0 : i32
    %c0_i32_1 = arith.constant 0 : i32
    return %c0_i32, %c0_i32_0 : i32, i32
  }
  func.func @transform_6(%arg0: i32, %arg1: i32) -> (i32, i32, i32) {
    %c0_i32 = arith.constant 0 : i32
    %c0_i32_0 = arith.constant 0 : i32
    return %arg0, %c0_i32, %arg1 : i32, i32, i32
  }
}

</mosaic_0001>

<bundles_post_ra>
// kernel: tpu_custom_call.1
= control target key start
LH: loop header
LB: loop body
LE: loop exit
PB: predicated region body
PF: predicated region fallthrough
CT: control target
= control target key end

     0   :  { %s2209_s0 = inlined_call_operand.hbm [shape: f32[2,2,256], index: 0, kind: input, shape index: {}]   ;;  %s2210_s1 = inlined_call_operand.hbm [shape: f32[2,4,256], index: 1, kind: input, shape index: {}]   ;;  %s2211_s2 = inlined_call_operand.vmem [shape: f32[2,8,256], index: 2, kind: input, shape index: {}]   ;;  %s2212_s3 = inlined_call_operand.vmem [shape: f32[4,1], index: 3, kind: input, shape index: {}]   ;;  %s2213_s4 = inlined_call_operand.vmem [shape: f32[16,4], index: 4, kind: input, shape index: {}]   ;;  %s2214_s5 = inlined_call_operand.vmem [shape: f32[16,1], index: 5, kind: input, shape index: {}]   ;;  %s2215_s6 = inlined_call_operand.hbm [shape: f32[2,8,256], index: 6, kind: output, shape index: {}]  }
   0x1   :  { %2223 = sst [smem:[#allocation17_spill]] %s2215_s6 }
   0x2   :  { %11 = vsyncpa [#allocation3], 0 }
   0x3   :  { %13 = vsyncpa [#allocation3 + $0x1], 0 }
   0x4   :  { %14 = vsyncpa [#allocation6], 0 }
   0x5   :  { %16 = vsyncpa [#allocation6 + $0x1], 0 }
   0x6   :  { %17 = vsyncpa [#allocation4], 0 }
   0x7   :  { %19 = vsyncpa [#allocation4 + $0x1], 0  ;;  %s1498_s21 = smov 0   ;;  %s1500_s22 = smov 0  }
   0x8   :  { %s1502_s23 = smov 0   ;;  %s1504_s24 = smov 0  }
   0x9   :  { %s1506_s25 = smov 0   ;;  %s1508_s26 = smov 0  }
   0xa   :  { %s1510_s27 = smov 0   ;;  %s1512_s28 = smov 0  }
   0xb   :  { %s1514_s29 = smov 0   ;;  %s1516_s30 = smov 0  }
   0xc   :  { %s1518_s7 = smov 0  }
   0xd LB: > { %2224 = sst [smem:[#allocation11_spill]] %s1431_s24  ;;  %s1097_s8 = sadd.s32 4294967295, %s1459_s7   ;;  %s1459_s7 = sphi %s1518_s7, %s25_s7   ;;  %s1455_s30 = sphi %s1516_s30, %s2253_s30   ;;  %s1451_s29 = sphi %s1514_s29, %s2252_s29   ;;  %s1447_s28 = sphi %s1512_s28, %s2251_s28   ;;  %s1443_s27 = sphi %s1510_s27, %s2250_s27   ;;  %s1439_s26 = sphi %s1508_s26, %s2249_s26   ;;  %s1435_s25 = sphi %s1506_s25, %s2248_s25   ;;  %s1431_s24 = sphi %s1504_s24, %s2247_s24   ;;  %s1427_s23 = sphi %s1502_s23, %s2246_s23   ;;  %s1423_s22 = sphi %s1500_s22, %s2245_s22   ;;  %s1419_s21 = sphi %s1498_s21, %s2244_s21  }
   0xe   : > { %s1098_s9 = sadd.s32 4294967294, %s1459_s7   ;;  %s34_s10 = sadd.s32 1, %s1451_s29 }
   0xf   : > { %s37_s11 = sadd.s32 1, %s1455_s30  ;;  %p35_p0 = scmp.ge.s32.totalorder %s34_s10, 2 }
  0x10   : > { %s46_s12 = sadd.s32 1, %s1439_s26  ;;  %p53_p1 = scmp.ne.s32.totalorder %s1439_s26, %s1435_s25 }
  0x11   : > { %p54_p2 = scmp.eq.s32.totalorder %s1459_s7, 0  ;;  %s2255_s10 = smov (%p35_p0, %s34_s10), 0 }
  0x12   : > { %2225 = sst [smem:[#allocation12_spill]] %s2255_s10  ;;  %s2257_s11 = smov (!%p35_p0, %s37_s11), %s1455_s30 }
  0x13   : > { %s42_s13 = ssub.s32 %s1451_s29, %s2255_s10  ;;  %p1568_p3 = por %p54_p2, %p53_p1 }
  0x14   : > { %p39_p4 = scmp.ge.s32.totalorder %s2257_s11, 2  ;;  %p59_p5 = scmp.ne.s32.totalorder %s1435_s25, %s1431_s24 }
  0x15   : > { %p1574_p6 = scmp.eq.s32.totalorder %s1097_s8, 0  ;;  %p202_p7 = scmp.eq.s32.totalorder %s1097_s8, 3 }
  0x16   : > { %s2259_s11 = smov (%p39_p4, %s2257_s11), 0  ;;  %p208_p10 = scmp.eq.s32.totalorder %s1098_s9, 3 }
  0x17   : > { %2228 = sst [smem:[#allocation13_spill]] %s2259_s11  ;;  %p1582_p8 = por %p1574_p6, %p59_p5 }
  0x18   : > { %p1586_p9 = por %p202_p7, %p53_p1  ;;  %s41_s18 = ssub.s32 %s1455_s30, %s2259_s11 }
  0x19   : > { %s43_s19 = sor.u32 %s42_s13, %s41_s18  ;;  %p70_p11 = scmp.eq.s32.totalorder %s41_s18, 0 }
  0x1a   : > { %s2230_s17 = scalar_select %p1586_p9, 1, 0 }
  0x1b   : > { %p44_p12 = scmp.eq.s32.totalorder %s43_s19, 0  ;;  %p1592_p13 = por %p208_p10, %p59_p5 }
  0x1c   : > { %2231 = sst [smem:[#allocation14_spill]] %s2230_s17  ;;  %p1175_p0 = scmp.lt.s32.totalorder %s1459_s7, 4 }
  0x1d   : > { %s2232_s20 = scalar_select %p1592_p13, 1, 0 }
  0x1e   : > { %s1598_s8 = scalar_select %p44_p12, %s1439_s26, %s46_s12  }
  0x1f   : > { %2233 = sst [smem:[#allocation15_spill]] %s2232_s20  ;;  %s237_s10 = sand.u32 1, %s1439_s26  }
  0x20   : > { %2234 = sst [smem:[#allocation16_spill]] %s1598_s8  ;;  %s1102_s24 = sshll.u32 %s1455_s30, 1 }
  0x21   : > { %s1101_s17 = sshll.u32 %s237_s10, 1  ;;  %s245_s9 = sadd.s32 %s1451_s29, %s1102_s24 }
  0x22   : > { %s1103_s13 = sshll.u32 %s245_s9, 1  ;;  %s241_s19 = scalar_lea.vmem [#allocation2], %s1101_s17 }
  0x23   : > { %s251_s11 = sshll.u32 %s241_s19, 4  ;;  %s247_s12 = scalar_lea.hbm %s2209_s0, %s1103_s13  ;;  %s252_s11 = int_to_ptr.vmem [resolvable:$true] %s251_s11 }
  0x24   : > { %s249_s8 = sshll.u32 %s247_s12, 4  ;;  %p1165_p1 = pnand %p1175_p0, %p1568_p3  ;;  %s250_s8 = int_to_ptr.hbm [resolvable:$true] %s249_s8 }
  0x25   : > { %p1107_p4 = scmp.ge.s32.totalorder %s1459_s7, 1  ;;  %p287_p5 = scmp.lt.s32.totalorder %s1459_s7, 5 }
  0x26   : > { %s238_s24 = scalar_lea.sflag [#allocation3], %s237_s10  ;;  %s72_s6 = sadd.s32 1, %s1427_s23 }
  0x27   : > { %1167 = dma.hbm_to_vmem [thread:$0]  (!%p1165_p1), %s250_s8, 32, %s252_s11, %s238_s24  }
  0x28   : > { %p1612_p7 = pnand %p1107_p4, %p287_p5  ;;  %p79_p10 = scmp.ne.s32.totalorder %s1427_s23, %s1423_s22 }
  0x29   : > { %s1619_s20 = scalar_select %p70_p11, %s1427_s23, %s72_s6  }
  0x2a   : > { %p85_p12 = scmp.ne.s32.totalorder %s1423_s22, %s1419_s21  ;;  %s258_s9 = sand.u32 1, %s1427_s23  }
  0x2b   : > { %s1155_s14 = sshll.u32 %s1455_s30, 3  ;;  %p81_p1 = por %p79_p10, %p54_p2 }
  0x2c   : > { %p1629_p3 = por %p85_p12, %p1574_p6  ;;  %s1104_s10 = sshll.u32 %s258_s9, 3 }
  0x2d   : > { %s267_s19 = scalar_lea.hbm %s2210_s1, %s1155_s14  ;;  %s262_s18 = scalar_lea.vmem [#allocation5], %s1104_s10 }
  0x2e   : > { %s269_s12 = sshll.u32 %s267_s19, 4  ;;  %s271_s24 = sshll.u32 %s262_s18, 4  ;;  %s270_s12 = int_to_ptr.hbm [resolvable:$true] %s269_s12  ;;  %s272_s24 = int_to_ptr.vmem [resolvable:$true] %s271_s24 }
  0x2f   : > { %p1168_p11 = pnand %p1175_p0, %p81_p1  ;;  %s259_s21 = scalar_lea.sflag [#allocation6], %s258_s9 }
  0x30   : > { %291 = sbr.rel (%p1612_p7) target bundleno = 504 (0x1f8), region = 44  ;;  %s1643_s15 = sand.u32 (!%p1612_p7), 1, %s1435_s25  }
  0x31   : > { %1170 = dma.hbm_to_vmem [thread:$0]  (!%p1168_p11), %s270_s12, 128, %s272_s24, %s259_s21  }
  0x32   : > { %s1108_s6 = sshll.u32 (!%p1612_p7), %s1643_s15, 1  ;;  %s294_s14 = scalar_lea.sflag (!%p1612_p7), [#allocation3], %s1643_s15 }
  0x33   : > { %s297_s11 = scalar_lea.vmem (!%p1612_p7), [#allocation2], %s1108_s6 }
  0x35   : > { %1406 = dma.done.wait (%p1582_p8), %s294_s14, 32  }
  0x36   : > { %1408 = vsyncadd (%p1582_p8), %s294_s14, 4294967264  ;;  %s303_s9 = sand.u32 1, %s1423_s22  }
  0x37   : > { %s1652_s10 = sshll.u32 %s303_s9, 3  ;;  %s304_s17 = scalar_lea.sflag [#allocation6], %s303_s9 }
  0x38   : > { %s307_s8 = scalar_lea.vmem [#allocation5], %s1652_s10 }
  0x39   : > { %1410 = dma.done.wait (%p1629_p3), %s304_s17, 128  }
  0x3a   : > { %1412 = vsyncadd (%p1629_p3), %s304_s17, 4294967168  ;;  %v358_v0 = vld [vmem:[%s297_s11] sm:$0x3]  ;;  %v387_v10 = vlaneseq  ;;  %v1461_v50 = vmov 0.0   ;;  %p350_p2 = scmp.lt.s32.totalorder %s1447_s28, 1  ;;  %p352_p6 = scmp.lt.s32.totalorder %s1443_s27, 1 }
  0x3b   : > { %v359_v1 = vadd.f32 1.0, %v358_v0  ;;  %s1110_s19 = sshll.u32 %s1643_s15, 3 }
  0x3c   : > { %v1659_v15 = vshrl.u32 %v387_v10, 7  ;;  %s351_s9 = scalar_select %p350_p2, %s1447_s28, 1 }
  0x3d   : > { %v360_v2 = vmul.f32 8.0, %v359_v1  ;;  %s353_s10 = scalar_select %p352_p6, %s1443_s27, 1 }
  0x3e   : > { %v400_v20 = vadd.s32 96, %v1659_v15  ;;  %v401_v22 = vadd.s32 104, %v1659_v15  ;;  %v402_v23 = vadd.s32 112, %v1659_v15  ;;  %v403_v24 = vadd.s32 120, %v1659_v15  ;;  %s1111_s17 = sshll.u32 %s351_s9, 1  ;;  %s2237_s9 = sld [smem:[#allocation17_spill]] }
  0x3f   : > { %v1113_v3 = vadd.f32 -0.5, %v360_v2  ;;  %v1667_v26 = vadd.s32 240, %v1659_v15  ;;  %v1670_v27 = vadd.s32 248, %v1659_v15  ;;  %vm594_vm7 = vcmp.lt.s32.totalorder %v1659_v15, 1  ;;  %s355_s16 = sadd.s32 %s1111_s17, %s353_s10  ;;  %s349_s10 = scalar_lea.vmem [#allocation7], %s1110_s19 }
  0x40   : > { %v417_v31 = vadd.s32 232, %v1659_v15  ;;  %v399_v34 = vadd.s32 88, %v1659_v15  ;;  %v416_v35 = vadd.s32 224, %v1659_v15  ;;  %v1678_v36 = vadd.s32 80, %v1659_v15  ;;  %s1112_s12 = sshll.u32 %s355_s16, 3  ;;  %s968_s17 = sshll.u32 %s349_s10, 4  ;;  %s969_s17 = int_to_ptr.vmem [resolvable:$true] %s968_s17 }
  0x41   : > { %v362_v4 = vfloor.f32 %v1113_v3  ;;  %v1681_v37 = vadd.s32 216, %v1659_v15  ;;  %v1686_v40 = vadd.s32 72, %v1659_v15  ;;  %v1689_v41 = vadd.s32 208, %v1659_v15  ;;  %s357_s6 = scalar_lea.vmem %s2211_s2, %s1112_s12  ;;  %s954_s16 = scalar_lea.sflag [#allocation4], %s1643_s15 }
  0x42   : > { %v1698_v45 = vadd.s32 64, %v1659_v15  ;;  %v1703_v47 = vadd.s32 200, %v1659_v15  ;;  %v1706_v48 = vadd.s32 56, %v1659_v15  ;;  %v1709_v49 = vadd.s32 192, %v1659_v15 }
  0x43   : > { %v363_v5 = vsub.f32 %v1113_v3, %v362_v4  ;;  %v1157_v6 = vcvt.f32.s32 %v362_v4 }
  0x44   : > { %s1353_s19 = scalar_lea.hbm %s2237_s9, 32 }
  0x45   : > { %v364_v7 = vsub.f32 1.0, %v363_v5  ;;  %vm366_vm0 = vcmp.ge.s32.totalorder %v1157_v6, 0  ;;  %vm367_vm1 = vcmp.le.s32.totalorder %v1157_v6, 15  ;;  %vm370_vm2 = vcmp.ge.s32.totalorder %v1157_v6, 4294967295 }
  0x46   : > { %vm368_vm3 = vmand %vm366_vm0, %vm367_vm1  ;;  %vm371_vm4 = vcmp.le.s32.totalorder %v1157_v6, 14  ;;  %v384_v8 = vmul.u32 16, %v1157_v6  ;;  %v385_v9 = vrot.slane %v1157_v6, 7 }
  0x47   : > { %vm372_vm5 = vmand %vm370_vm2, %vm371_vm4  ;;  %v369_v12 = vsel %vm368_vm3, %v364_v7, 0.0 }
  0x48   : > { %v386_v11 = vadd.s32 %v385_v9, %v384_v8  ;;  %v373_v13 = vsel %vm372_vm5, %v363_v5, 0.0  ;;  %v375_v16 = vrot.slane %v369_v12, 7 }
  0x49   : > { %v379_v18 = vrot.slane %v373_v13, 7 }
  0x4a   : > { %vm420_vm6 = vcmp.lt.s32.totalorder %v386_v11, 0  ;;  %v421_v14 = vsub.s32 0, %v386_v11  ;;  %v377_v25 = vmul.f32 %v375_v16, %v369_v12  ;;  %v382_v29 = vmul.f32 %v375_v16, %v373_v13 }
  0x4b   : > { %v381_v28 = vmul.f32 %v379_v18, %v369_v12  ;;  %v383_v32 = vmul.f32 %v379_v18, %v373_v13 }
  0x4c   : > { %v422_v17 = vsel %vm420_vm6, %v421_v14, %v386_v11  ;;  %v1683_v39 = vperm.slane %v377_v25, 1  ;;  %v1695_v44 = vperm.slane %v382_v29, 1 }
  0x4d   : > { %v424_v19 = vand.u32 255, %v422_v17  ;;  %v1693_v43 = vperm.slane %v381_v28, 1  ;;  %v1700_v46 = vperm.slane %v383_v32, 1 }
  0x4f   : > { %v425_v21 = vsub.s32 0, %v424_v19 }
  0x51   : > { %v426_v30 = vsel %vm420_vm6, %v425_v21, %v424_v19 }
  0x52   : > { %vm427_vm8 = vcmp.ne.s32.totalorder %v426_v30, 0  ;;  %vm428_vm9 = vcmp.lt.s32.totalorder %v426_v30, 0  ;;  %v430_v33 = vadd.s32 256, %v426_v30 }
  0x53   : > { %vm429_vm10 = vmand %vm428_vm9, %vm427_vm8 }
  0x54   : > { %v431_v38 = vsel %vm429_vm10, %v430_v33, %v426_v30 }
  0x55   : > { %v1691_v42 = vperm.slane %v431_v38, 1 }
  0x57   : > { %vm445_vm11 = vcmp.eq.s32.totalorder %v400_v20, %v1691_v42  ;;  %vm446_vm12 = vcmp.eq.s32.totalorder %v401_v22, %v1691_v42  ;;  %vm447_vm13 = vcmp.eq.s32.totalorder %v402_v23, %v1691_v42  ;;  %vm448_vm14 = vcmp.eq.s32.totalorder %v403_v24, %v1691_v42 }
  0x58   : > { %v1716_v51 = vsel %vm445_vm11, 1.0, %v1461_v50  ;;  %v1127_v52 = vsel %vm446_vm12, 1.0, %v1461_v50  ;;  %v1720_v53 = vsel %vm447_vm13, 1.0, %v1461_v50  ;;  %v1723_v54 = vsel %vm448_vm14, 1.0, %v1461_v50 }
  0x59   : > { %v545_v55 = vmul.f32 %v1723_v54, %v1683_v39  ;;  %v574_v56 = vrot.slane %v1716_v51, 7  ;;  %v575_v57 = vrot.slane %v1127_v52, 7  ;;  %v576_v58 = vrot.slane %v1720_v53, 7 }
  0x5a   : > { %v577_v59 = vrot.slane %v1723_v54, 7  ;;  %v708_v60 = vmul.f32 %v1127_v52, %v1695_v44  ;;  %vm444_vm15 = vcmp.eq.s32.totalorder %v399_v34, %v1691_v42  ;;  %v544_v61 = vmul.f32 %v1720_v53, %v1683_v39 }
  0x5b   : > { %v613_v62 = vsel %vm594_vm7, %v574_v56, %v575_v57  ;;  %v1737_v63 = vsel %vm444_vm15, 1.0, %v1461_v50  ;;  %v1741_v0 = vsel %vm594_vm7, %v575_v57, %v576_v58  ;;  %v707_v1 = vmul.f32 %v1716_v51, %v1695_v44 }
  0x5c   : > { %v1749_v2 = vsel %vm594_vm7, %v576_v58, %v577_v59  ;;  %v641_v3 = vmul.f32 %v1693_v43, %v613_v62  ;;  %v773_v4 = vmul.f32 %v1700_v46, %v613_v62  ;;  %v573_v5 = vrot.slane %v1737_v63, 7 }
  0x5d   : > { %v643_v6 = vmul.f32 %v1693_v43, %v1749_v2  ;;  %v642_v7 = vmul.f32 %v1693_v43, %v1741_v0  ;;  %vm461_vm0 = vcmp.eq.s32.totalorder %v416_v35, %v1691_v42  ;;  %vm462_vm1 = vcmp.eq.s32.totalorder %v417_v31, %v1691_v42 }
  0x5e   : > { %v614_v8 = vsel %vm594_vm7, %v573_v5, %v574_v56  ;;  %vm463_vm2 = vcmp.eq.s32.totalorder %v1667_v26, %v1691_v42  ;;  %vm464_vm3 = vcmp.eq.s32.totalorder %v1670_v27, %v1691_v42  ;;  %v1767_v9 = vsel %vm461_vm0, 1.0, %v1461_v50 }
  0x5f   : > { %v675_v10 = vadd.f32 %v643_v6, %v545_v55  ;;  %v640_v11 = vmul.f32 %v1693_v43, %v614_v8  ;;  %v674_v12 = vadd.f32 %v642_v7, %v544_v61  ;;  %v772_v13 = vmul.f32 %v1700_v46, %v614_v8 }
  0x60   : > { %v1143_v14 = vsel %vm462_vm1, 1.0, %v1461_v50  ;;  %v1773_v16 = vsel %vm463_vm2, 1.0, %v1461_v50  ;;  %v1776_v17 = vsel %vm464_vm3, 1.0, %v1461_v50  ;;  %v590_v18 = vrot.slane %v1767_v9, 7 }
  0x61   : > { %v740_v19 = vadd.f32 %v708_v60, %v675_v10  ;;  %v739_v20 = vadd.f32 %v707_v1, %v674_v12  ;;  %v561_v21 = vmul.f32 %v1776_v17, %v1683_v39  ;;  %v591_v22 = vrot.slane %v1143_v14, 7 }
  0x62   : > { %v592_v23 = vrot.slane %v1773_v16, 7  ;;  %v593_v24 = vrot.slane %v1776_v17, 7  ;;  %v724_v25 = vmul.f32 %v1143_v14, %v1695_v44  ;;  %vm443_vm4 = vcmp.eq.s32.totalorder %v1678_v36, %v1691_v42 }
  0x63   : > { %v805_v26 = vadd.f32 %v773_v4, %v740_v19  ;;  %v804_v27 = vadd.f32 %v772_v13, %v739_v20  ;;  %v597_v28 = vsel %vm594_vm7, %v590_v18, %v591_v22  ;;  %v1789_v29 = vsel %vm443_vm4, 1.0, %v1461_v50 }
  0x64   : > { %v1795_v30 = vsel %vm594_vm7, %v592_v23, %v593_v24  ;;  %v657_v31 = vmul.f32 %v1693_v43, %v597_v28  ;;  %v789_v32 = vmul.f32 %v1700_v46, %v597_v28  ;;  %v543_v33 = vmul.f32 %v1127_v52, %v1683_v39 }
  0x65   : > { %835 = vmatpush.msra.mxu0 %v805_v26  ;;  %v659_v34 = vmul.f32 %v1693_v43, %v1795_v30  ;;  %v572_v35 = vrot.slane %v1789_v29, 7  ;;  %v706_v36 = vmul.f32 %v1737_v63, %v1695_v44  ;;  %vm460_vm5 = vcmp.eq.s32.totalorder %v1681_v37, %v1691_v42 }
  0x66   : > { %v673_v38 = vadd.f32 %v641_v3, %v543_v33  ;;  %v1808_v55 = vsel %vm460_vm5, 1.0, %v1461_v50  ;;  %v560_v56 = vmul.f32 %v1773_v16, %v1683_v39  ;;  %v1814_v52 = vsel %vm594_vm7, %v591_v22, %v592_v23 }
  0x67   : > { %836 = vmatpush.msra.mxu0 %v804_v27  ;;  %v691_v57 = vadd.f32 %v659_v34, %v561_v21  ;;  %v615_v58 = vsel %vm594_vm7, %v572_v35, %v573_v5  ;;  %v589_v60 = vrot.slane %v1808_v55, 7  ;;  %v658_v37 = vmul.f32 %v1693_v43, %v1814_v52 }
  0x68   : > { %v639_v61 = vmul.f32 %v1693_v43, %v615_v58  ;;  %v738_v62 = vadd.f32 %v706_v36, %v673_v38  ;;  %v771_v1 = vmul.f32 %v1700_v46, %v615_v58  ;;  %v723_v3 = vmul.f32 %v1767_v9, %v1695_v44 }
  0x69   : > { %v756_v4 = vadd.f32 %v724_v25, %v691_v57  ;;  %v598_v6 = vsel %vm594_vm7, %v589_v60, %v590_v18  ;;  %v690_v7 = vadd.f32 %v658_v37, %v560_v56  ;;  %vm442_vm6 = vcmp.eq.s32.totalorder %v1686_v40, %v1691_v42 }
  0x6a   : > { %v803_v5 = vadd.f32 %v771_v1, %v738_v62  ;;  %v656_v8 = vmul.f32 %v1693_v43, %v598_v6  ;;  %v788_v10 = vmul.f32 %v1700_v46, %v598_v6  ;;  %v1832_v12 = vsel %vm442_vm6, 1.0, %v1461_v50 }
  0x6b   : > { %v821_v13 = vadd.f32 %v789_v32, %v756_v4  ;;  %v755_v19 = vadd.f32 %v723_v3, %v690_v7  ;;  %v542_v20 = vmul.f32 %v1716_v51, %v1683_v39  ;;  %v571_v21 = vrot.slane %v1832_v12, 7 }
  0x6c   : > { %837 = vmatpush.msra.mxu0 %v803_v5  ;;  %v705_v18 = vmul.f32 %v1789_v29, %v1695_v44  ;;  %vm459_vm8 = vcmp.eq.s32.totalorder %v1689_v41, %v1691_v42  ;;  %v559_v40 = vmul.f32 %v1143_v14, %v1683_v39  ;;  %v722_v22 = vmul.f32 %v1808_v55, %v1695_v44 }
  0x6d   : > { %855 = vmatpush.msra.mxu1 %v821_v13  ;;  %v820_v23 = vadd.f32 %v788_v10, %v755_v19  ;;  %v616_v25 = vsel %vm594_vm7, %v571_v21, %v572_v35  ;;  %v672_v51 = vadd.f32 %v640_v11, %v542_v20  ;;  %v1847_v26 = vsel %vm459_vm8, 1.0, %v1461_v50 }
  0x6e   : > { %v638_v27 = vmul.f32 %v1693_v43, %v616_v25  ;;  %v770_v28 = vmul.f32 %v1700_v46, %v616_v25  ;;  %v588_v41 = vrot.slane %v1847_v26, 7  ;;  %v689_v32 = vadd.f32 %v657_v31, %v559_v40 }
  0x6f   : > { %856 = vmatpush.msra.mxu1 %v820_v23  ;;  %v737_v14 = vadd.f32 %v705_v18, %v672_v51  ;;  %vm441_vm9 = vcmp.eq.s32.totalorder %v1698_v45, %v1691_v42  ;;  %v541_v33 = vmul.f32 %v1737_v63, %v1683_v39  ;;  %v704_v11 = vmul.f32 %v1832_v12, %v1695_v44 }
  0x70   : > { %v599_v34 = vsel %vm594_vm7, %v588_v41, %v589_v60  ;;  %v754_v35 = vadd.f32 %v722_v22, %v689_v32  ;;  %v1122_v36 = vsel %vm441_vm9, 1.0, %v1461_v50  ;;  %vm458_vm10 = vcmp.eq.s32.totalorder %v1703_v47, %v1691_v42 }
  0x71   : > { %v802_v31 = vadd.f32 %v770_v28, %v737_v14  ;;  %v655_v38 = vmul.f32 %v1693_v43, %v599_v34  ;;  %v787_v45 = vmul.f32 %v1700_v46, %v599_v34  ;;  %v570_v56 = vrot.slane %v1122_v36, 7 }
  0x72   : > { %v671_v57 = vadd.f32 %v639_v61, %v541_v33  ;;  %v1866_v63 = vsel %vm458_vm10, 1.0, %v1461_v50  ;;  %v558_v58 = vmul.f32 %v1767_v9, %v1683_v39  ;;  %v721_v60 = vmul.f32 %v1847_v26, %v1695_v44 }
  0x73   : > { %838 = vmatpush.msra.mxu0 %v802_v31  ;;  %v819_v37 = vadd.f32 %v787_v45, %v754_v35  ;;  %v617_v47 = vsel %vm594_vm7, %v570_v56, %v571_v21  ;;  %v587_v62 = vrot.slane %v1866_v63, 7  ;;  %vm440_vm11 = vcmp.eq.s32.totalorder %v1706_v48, %v1691_v42 }
  0x74   : > { %v637_v61 = vmul.f32 %v1693_v43, %v617_v47  ;;  %v736_v1 = vadd.f32 %v704_v11, %v671_v57  ;;  %v769_v3 = vmul.f32 %v1700_v46, %v617_v47  ;;  %v688_v4 = vadd.f32 %v656_v8, %v558_v58 }
  0x75   : > { %857 = vmatpush.msra.mxu1 %v819_v37  ;;  %v600_v9 = vsel %vm594_vm7, %v587_v62, %v588_v41  ;;  %v1882_v6 = vsel %vm440_vm11, 1.0, %v1461_v50  ;;  %v540_v7 = vmul.f32 %v1789_v29, %v1683_v39  ;;  %v703_v5 = vmul.f32 %v1122_v36, %v1695_v44 }
  0x76   : > { %v801_v10 = vadd.f32 %v769_v3, %v736_v1  ;;  %v654_v48 = vmul.f32 %v1693_v43, %v600_v9  ;;  %v753_v13 = vadd.f32 %v721_v60, %v688_v4  ;;  %v786_v19 = vmul.f32 %v1700_v46, %v600_v9 }
  0x77   : > { %v569_v8 = vrot.slane %v1882_v6, 7  ;;  %v670_v20 = vadd.f32 %v638_v27, %v540_v7  ;;  %vm457_vm12 = vcmp.eq.s32.totalorder %v1709_v49, %v1691_v42  ;;  %v557_v21 = vmul.f32 %v1808_v55, %v1683_v39 }
  0x78   : > { %839 = vmatpush.msra.mxu0 %v801_v10  ;;  %v818_v18 = vadd.f32 %v786_v19, %v753_v13  ;;  %v1895_v29 = vsel %vm457_vm12, 1.0, %v1461_v50  ;;  %v720_v40 = vmul.f32 %v1866_v63, %v1695_v44  ;;  %v394_v22 = vadd.s32 48, %v1659_v15 }
  0x79   : > { %v618_v23 = vsel %vm594_vm7, %v569_v8, %v570_v56  ;;  %v735_v25 = vadd.f32 %v703_v5, %v670_v20  ;;  %v586_v51 = vrot.slane %v1895_v29, 7  ;;  %v687_v49 = vadd.f32 %v655_v38, %v557_v21 }
  0x7a   : > { %858 = vmatpush.msra.mxu1 %v818_v18  ;;  %v636_v55 = vmul.f32 %v1693_v43, %v618_v23  ;;  %v768_v27 = vmul.f32 %v1700_v46, %v618_v23  ;;  %vm439_vm13 = vcmp.eq.s32.totalorder %v394_v22, %v1691_v42  ;;  %v539_v28 = vmul.f32 %v1832_v12, %v1683_v39 }
  0x7b   : > { %v601_v41 = vsel %vm594_vm7, %v586_v51, %v587_v62  ;;  %v752_v32 = vadd.f32 %v720_v40, %v687_v49  ;;  %v1911_v14 = vsel %vm439_vm13, 1.0, %v1461_v50  ;;  %v702_v33 = vmul.f32 %v1882_v6, %v1695_v44 }
  0x7c   : > { %v800_v11 = vadd.f32 %v768_v27, %v735_v25  ;;  %v653_v34 = vmul.f32 %v1693_v43, %v601_v41  ;;  %v785_v35 = vmul.f32 %v1700_v46, %v601_v41  ;;  %v568_v31 = vrot.slane %v1911_v14, 7 }
  0x7d   : > { %v669_v38 = vadd.f32 %v637_v61, %v539_v28  ;;  %v411_v12 = vadd.s32 184, %v1659_v15  ;;  %v556_v45 = vmul.f32 %v1847_v26, %v1683_v39  ;;  %v719_v56 = vmul.f32 %v1895_v29, %v1695_v44 }
  0x7e   : > { %840 = vmatpush.msra.mxu0 %v800_v11  ;;  %v817_v57 = vadd.f32 %v785_v35, %v752_v32  ;;  %v619_v58 = vsel %vm594_vm7, %v568_v31, %v569_v8  ;;  %v393_v60 = vadd.s32 40, %v1659_v15  ;;  %v538_v37 = vmul.f32 %v1122_v36, %v1683_v39 }
  0x7f   : > { %v635_v47 = vmul.f32 %v1693_v43, %v619_v58  ;;  %v734_v62 = vadd.f32 %v702_v33, %v669_v38  ;;  %v767_v61 = vmul.f32 %v1700_v46, %v619_v58  ;;  %vm456_vm14 = vcmp.eq.s32.totalorder %v411_v12, %v1691_v42 }
  0x80   : > { %859 = vmatpush.msra.mxu1 %v817_v57  ;;  %v1931_v26 = vsel %vm456_vm14, 1.0, %v1461_v50  ;;  %v686_v1 = vadd.f32 %v654_v48, %v556_v45  ;;  %vm438_vm15 = vcmp.eq.s32.totalorder %v393_v60, %v1691_v42  ;;  %v668_v3 = vadd.f32 %v636_v55, %v538_v37 }
  0x81   : > { %v799_v4 = vadd.f32 %v767_v61, %v734_v62  ;;  %v585_v9 = vrot.slane %v1931_v26, 7  ;;  %v1936_v36 = vsel %vm438_vm15, 1.0, %v1461_v50  ;;  %v701_v7 = vmul.f32 %v1911_v14, %v1695_v44 }
  0x82   : > { %v751_v5 = vadd.f32 %v719_v56, %v686_v1  ;;  %v567_v10 = vrot.slane %v1936_v36, 7  ;;  %v410_v13 = vadd.s32 176, %v1659_v15  ;;  %v555_v48 = vmul.f32 %v1866_v63, %v1683_v39 }
  0x83   : > { %841 = vmatpush.msra.mxu0 %v799_v4  ;;  %v602_v19 = vsel %vm594_vm7, %v585_v9, %v586_v51  ;;  %v733_v8 = vadd.f32 %v701_v7, %v668_v3  ;;  %v718_v20 = vmul.f32 %v1931_v26, %v1695_v44  ;;  %v392_v21 = vadd.s32 32, %v1659_v15 }
  0x84   : > { %v652_v18 = vmul.f32 %v1693_v43, %v602_v19  ;;  %v784_v40 = vmul.f32 %v1700_v46, %v602_v19  ;;  %v620_v22 = vsel %vm594_vm7, %v567_v10, %v568_v31  ;;  %vm455_vm0 = vcmp.eq.s32.totalorder %v410_v13, %v1691_v42 }
  0x85   : > { %v634_v63 = vmul.f32 %v1693_v43, %v620_v22  ;;  %v766_v23 = vmul.f32 %v1700_v46, %v620_v22  ;;  %v1957_v25 = vsel %vm455_vm0, 1.0, %v1461_v50  ;;  %v685_v51 = vadd.f32 %v653_v34, %v555_v48 }
  0x86   : > { %v816_v49 = vadd.f32 %v784_v40, %v751_v5  ;;  %v584_v55 = vrot.slane %v1957_v25, 7  ;;  %vm437_vm1 = vcmp.eq.s32.totalorder %v392_v21, %v1691_v42  ;;  %v537_v27 = vmul.f32 %v1882_v6, %v1683_v39  ;;  %v822_v5 = vld [vmem:[%s307_s8] sm:$0xff]  ;;  %s1151_s8 = sshll.u32 %s1447_s28, 1 }
  0x87   : > { %v798_v28 = vadd.f32 %v766_v23, %v733_v8  ;;  %v750_v41 = vadd.f32 %v718_v20, %v685_v51  ;;  %v1964_v32 = vsel %vm437_vm1, 1.0, %v1461_v50  ;;  %v700_v33 = vmul.f32 %v1936_v36, %v1695_v44  ;;  %830 = vst [vmem:[#allocation1] ss:$2 sm:$0xff] %v822_v5  ;;  %s964_s13 = sadd.s32 %s1443_s27, %s1151_s8 }
  0x88   : > { %860 = vmatpush.msra.mxu1 %v816_v49  ;;  %v603_v11 = vsel %vm594_vm7, %v584_v55, %v585_v9  ;;  %v566_v34 = vrot.slane %v1964_v32, 7  ;;  %v667_v35 = vadd.f32 %v635_v47, %v537_v27  ;;  %v409_v31 = vadd.s32 168, %v1659_v15  ;;  %s1152_s18 = sshll.u32 %s964_s13, 3 }
  0x89   : > { %842 = vmatpush.msra.mxu0 %v798_v28  ;;  %v651_v6 = vmul.f32 %v1693_v43, %v603_v11  ;;  %v783_v38 = vmul.f32 %v1700_v46, %v603_v11  ;;  %v554_v12 = vmul.f32 %v1895_v29, %v1683_v39  ;;  %v717_v45 = vmul.f32 %v1957_v25, %v1695_v44  ;;  %s966_s28 = scalar_lea.hbm %s2237_s9, %s1152_s18 }
  0x8a   : > { %v621_v56 = vsel %vm594_vm7, %v566_v34, %v567_v10  ;;  %v732_v57 = vadd.f32 %v700_v33, %v667_v35  ;;  %vm454_vm2 = vcmp.eq.s32.totalorder %v409_v31, %v1691_v42  ;;  %v391_v58 = vadd.s32 24, %v1659_v15  ;;  %s970_s8 = sshll.u32 %s966_s28, 4  ;;  %s971_s8 = int_to_ptr.hbm [resolvable:$true] %s970_s8 }
  0x8b   : > { %v815_v60 = vadd.f32 %v783_v38, %v750_v41  ;;  %v633_v37 = vmul.f32 %v1693_v43, %v621_v56  ;;  %v765_v47 = vmul.f32 %v1700_v46, %v621_v56  ;;  %v1985_v62 = vsel %vm454_vm2, 1.0, %v1461_v50  ;;  %s1347_s13 = sshra.s32 %s971_s8, 4  ;;  %s1348_s13 = int_to_ptr.hbm [resolvable:$true] %s1347_s13 }
  0x8c   : > { %v583_v29 = vrot.slane %v1985_v62, 7  ;;  %v684_v61 = vadd.f32 %v652_v18, %v554_v12  ;;  %vm436_vm3 = vcmp.eq.s32.totalorder %v391_v58, %v1691_v42  ;;  %v536_v1 = vmul.f32 %v1911_v14, %v1683_v39  ;;  %s1349_s12 = scalar_lea.hbm %s1348_s13, 8  ;;  %p1354_p5 = scmp.lt.s32.totalorder %s1348_s13, %s2237_s9 }
  0x8d   : > { %861 = vmatpush.msra.mxu1 %v815_v60  ;;  %v797_v3 = vadd.f32 %v765_v47, %v732_v57  ;;  %v1992_v4 = vsel %vm436_vm3, 1.0, %v1461_v50  ;;  %v699_v9 = vmul.f32 %v1964_v32, %v1695_v44  ;;  %v408_v7 = vadd.s32 160, %v1659_v15  ;;  %p1350_p8 = scmp.ne.s32.totalorder %s1348_s13, %s1349_s12  ;;  %p1355_p7 = scmp.lt.s32.totalorder %s1353_s19, %s1349_s12 }
  0x8e   : > { %v604_v10 = vsel %vm594_vm7, %v583_v29, %v584_v55  ;;  %v749_v13 = vadd.f32 %v717_v45, %v684_v61  ;;  %v565_v48 = vrot.slane %v1992_v4, 7  ;;  %v666_v19 = vadd.f32 %v634_v63, %v536_v1 }
  0x8f   : > { %843 = vmatpush.msra.mxu0 %v797_v3  ;;  %v650_v14 = vmul.f32 %v1693_v43, %v604_v10  ;;  %v782_v8 = vmul.f32 %v1700_v46, %v604_v10  ;;  %vm453_vm4 = vcmp.eq.s32.totalorder %v408_v7, %v1691_v42  ;;  %v553_v20 = vmul.f32 %v1931_v26, %v1683_v39  ;;  %p1351_p0 = pnand %p1350_p8, %p1586_p9  ;;  %p1356_p10 = por %p1355_p7, %p1354_p5 }
  0x90   : > { %v622_v21 = vsel %vm594_vm7, %v565_v48, %v566_v34  ;;  %v731_v18 = vadd.f32 %v699_v9, %v666_v19  ;;  %v2010_v40 = vsel %vm453_vm4, 1.0, %v1461_v50  ;;  %v716_v22 = vmul.f32 %v1985_v62, %v1695_v44 }
  0x91   : > { %v814_v63 = vadd.f32 %v782_v8, %v749_v13  ;;  %v632_v23 = vmul.f32 %v1693_v43, %v622_v21  ;;  %v764_v51 = vmul.f32 %v1700_v46, %v622_v21  ;;  %v582_v49 = vrot.slane %v2010_v40, 7  ;;  %p1352_p4 = pneg %p1351_p0 }
  0x92   : > { %v683_v55 = vadd.f32 %v651_v6, %v553_v20  ;;  %v390_v26 = vadd.s32 16, %v1659_v15  ;;  %v535_v27 = vmul.f32 %v1936_v36, %v1683_v39  ;;  %v698_v28 = vmul.f32 %v1992_v4, %v1695_v44 }
  0x93   : > { %862 = vmatpush.msra.mxu1 %v814_v63  ;;  %v796_v41 = vadd.f32 %v764_v51, %v731_v18  ;;  %v605_v33 = vsel %vm594_vm7, %v582_v49, %v583_v29  ;;  %v407_v11 = vadd.s32 152, %v1659_v15  ;;  %v552_v34 = vmul.f32 %v1957_v25, %v1683_v39  ;;  %p1357_p12 = pnand %p1356_p10, %p1352_p4 }
  0x94   : > { %v649_v35 = vmul.f32 %v1693_v43, %v605_v33  ;;  %v748_v31 = vadd.f32 %v716_v22, %v683_v55  ;;  %v781_v6 = vmul.f32 %v1700_v46, %v605_v33  ;;  %vm435_vm5 = vcmp.eq.s32.totalorder %v390_v26, %v1691_v42 }
  0x95   : > { %844 = vmatpush.msra.mxu0 %v796_v41  ;;  %v1116_v36 = vsel %vm435_vm5, 1.0, %v1461_v50  ;;  %v665_v38 = vadd.f32 %v633_v37, %v535_v27  ;;  %vm452_vm6 = vcmp.eq.s32.totalorder %v407_v11, %v1691_v42  ;;  %v682_v12 = vadd.f32 %v650_v14, %v552_v34 }
  0x96   : > { %v813_v45 = vadd.f32 %v781_v6, %v748_v31  ;;  %v564_v56 = vrot.slane %v1116_v36, 7  ;;  %v2033_v57 = vsel %vm452_vm6, 1.0, %v1461_v50  ;;  %v715_v25 = vmul.f32 %v2010_v40, %v1695_v44 }
  0x97   : > { %v730_v58 = vadd.f32 %v698_v28, %v665_v38  ;;  %v581_v60 = vrot.slane %v2033_v57, 7  ;;  %v389_v47 = vadd.s32 8, %v1659_v15  ;;  %v534_v29 = vmul.f32 %v1964_v32, %v1683_v39 }
  0x98   : > { %863 = vmatpush.msra.mxu1 %v813_v45  ;;  %v623_v37 = vsel %vm594_vm7, %v564_v56, %v565_v48  ;;  %v747_v61 = vadd.f32 %v715_v25, %v682_v12  ;;  %v697_v1 = vmul.f32 %v1116_v36, %v1695_v44  ;;  %v406_v3 = vadd.s32 144, %v1659_v15 }
  0x99   : > { %v631_v9 = vmul.f32 %v1693_v43, %v623_v37  ;;  %v763_v7 = vmul.f32 %v1700_v46, %v623_v37  ;;  %v606_v5 = vsel %vm594_vm7, %v581_v60, %v582_v49  ;;  %vm434_vm8 = vcmp.eq.s32.totalorder %v389_v47, %v1691_v42 }
  0x9a   : > { %v648_v32 = vmul.f32 %v1693_v43, %v606_v5  ;;  %v780_v10 = vmul.f32 %v1700_v46, %v606_v5  ;;  %v1115_v13 = vsel %vm434_vm8, 1.0, %v1461_v50  ;;  %v664_v48 = vadd.f32 %v632_v23, %v534_v29 }
  0x9b   : > { %v795_v19 = vadd.f32 %v763_v7, %v730_v58  ;;  %v563_v14 = vrot.slane %v1115_v13, 7  ;;  %vm451_vm9 = vcmp.eq.s32.totalorder %v406_v3, %v1691_v42  ;;  %v551_v8 = vmul.f32 %v1985_v62, %v1683_v39 }
  0x9c   : > { %v812_v20 = vadd.f32 %v780_v10, %v747_v61  ;;  %v729_v21 = vadd.f32 %v697_v1, %v664_v48  ;;  %v1132_v18 = vsel %vm451_vm9, 1.0, %v1461_v50  ;;  %v714_v22 = vmul.f32 %v2033_v57, %v1695_v44 }
  0x9d   : > { %845 = vmatpush.msra.mxu0 %v795_v19  ;;  %v624_v63 = vsel %vm594_vm7, %v563_v14, %v564_v56  ;;  %v580_v51 = vrot.slane %v1132_v18, 7  ;;  %v681_v23 = vadd.f32 %v649_v35, %v551_v8  ;;  %vm433_vm10 = vcmp.eq.s32.totalorder %v1659_v15, %v1691_v42 }
  0x9e   : > { %864 = vmatpush.msra.mxu1 %v812_v20  ;;  %v630_v49 = vmul.f32 %v1693_v43, %v624_v63  ;;  %v762_v62 = vmul.f32 %v1700_v46, %v624_v63  ;;  %v1114_v55 = vsel %vm433_vm10, 1.0, %v1461_v50  ;;  %v533_v26 = vmul.f32 %v1992_v4, %v1683_v39 }
  0x9f   : > { %v607_v27 = vsel %vm594_vm7, %v580_v51, %v581_v60  ;;  %v746_v28 = vadd.f32 %v714_v22, %v681_v23  ;;  %v562_v41 = vrot.slane %v1114_v55, 7  ;;  %v696_v33 = vmul.f32 %v1115_v13, %v1695_v44 }
  0xa0   : > { %v794_v11 = vadd.f32 %v762_v62, %v729_v21  ;;  %v647_v34 = vmul.f32 %v1693_v43, %v607_v27  ;;  %v779_v35 = vmul.f32 %v1700_v46, %v607_v27  ;;  %v663_v31 = vadd.f32 %v631_v9, %v533_v26 }
  0xa1   : > { %v625_v6 = vsel %vm594_vm7, %v562_v41, %v563_v14  ;;  %v405_v38 = vadd.s32 136, %v1659_v15  ;;  %v550_v4 = vmul.f32 %v2010_v40, %v1683_v39  ;;  %v713_v12 = vmul.f32 %v1132_v18, %v1695_v44 }
  0xa2   : > { %846 = vmatpush.msra.mxu0 %v794_v11  ;;  %v811_v45 = vadd.f32 %v779_v35, %v746_v28  ;;  %v629_v56 = vmul.f32 %v1693_v43, %v625_v6  ;;  %v728_v25 = vadd.f32 %v696_v33, %v663_v31  ;;  %v761_v58 = vmul.f32 %v1700_v46, %v625_v6 }
  0xa3   : > { %vm450_vm11 = vcmp.eq.s32.totalorder %v405_v38, %v1691_v42  ;;  %v680_v60 = vadd.f32 %v648_v32, %v550_v4  ;;  %v532_v47 = vmul.f32 %v1116_v36, %v1683_v39  ;;  %v626_v29 = vsel %vm594_vm7, %v593_v24, %v562_v41 }
  0xa4   : > { %865 = vmatpush.msra.mxu1 %v811_v45  ;;  %v793_v40 = vadd.f32 %v761_v58, %v728_v25  ;;  %v1131_v37 = vsel %vm450_vm11, 1.0, %v1461_v50  ;;  %v628_v61 = vmul.f32 %v1693_v43, %v626_v29  ;;  %v695_v1 = vmul.f32 %v1114_v55, %v1695_v44  ;;  %v823_v45 = vld [vmem:[%s2212_s3] sm:$0xf] }
  0xa5   : > { %v579_v3 = vrot.slane %v1131_v37, 7  ;;  %v745_v9 = vadd.f32 %v713_v12, %v680_v60  ;;  %v662_v7 = vadd.f32 %v630_v49, %v532_v47  ;;  %v760_v5 = vmul.f32 %v1700_v46, %v626_v29  ;;  %v831_v60 = vld.sshfl [vmem:[#allocation1] sm:$0xff pattern:$0x75316420] }
  0xa6   : > { %847 = vmatpush.msra.mxu0 %v793_v40  ;;  %v404_v36 = vadd.s32 128, %v1659_v15  ;;  %v549_v32 = vmul.f32 %v2033_v57, %v1683_v39  ;;  %v712_v24 = vmul.f32 %v1131_v37, %v1695_v44  ;;  %v531_v10 = vmul.f32 %v1115_v13, %v1683_v39 }
  0xa7   : > { %v608_v48 = vsel %vm594_vm7, %v579_v3, %v580_v51  ;;  %v727_v19 = vadd.f32 %v695_v1, %v662_v7  ;;  %v694_v14 = vmul.f32 %v1776_v17, %v1695_v44  ;;  %v759_v8 = vmul.f32 %v1700_v46, %v1795_v30  ;;  %v877_v7 = vld [vmem:[%s2213_s4 + $0x8] sm:$0xff] }
  0xa8   : > { %v646_v20 = vmul.f32 %v1693_v43, %v608_v48  ;;  %v778_v21 = vmul.f32 %v1700_v46, %v608_v48  ;;  %vm449_vm12 = vcmp.eq.s32.totalorder %v404_v36, %v1691_v42  ;;  %v679_v57 = vadd.f32 %v647_v34, %v549_v32 }
  0xa9   : > { %v792_v22 = vadd.f32 %v760_v5, %v727_v19  ;;  %v1130_v13 = vsel %vm449_vm12, 1.0, %v1461_v50  ;;  %v661_v63 = vadd.f32 %v629_v56, %v531_v10  ;;  %v548_v51 = vmul.f32 %v1132_v18, %v1683_v39 }
  0xaa   : > { %v810_v23 = vadd.f32 %v778_v21, %v745_v9  ;;  %v578_v49 = vrot.slane %v1130_v13, 7  ;;  %v744_v62 = vadd.f32 %v712_v24, %v679_v57  ;;  %v711_v17 = vmul.f32 %v1130_v13, %v1695_v44  ;;  %v876_v9 = vld [vmem:[%s2213_s4] sm:$0xff] }
  0xab   : > { %848 = vmatpush.msra.mxu0 %v792_v22  ;;  %v726_v30 = vadd.f32 %v694_v14, %v661_v63  ;;  %v678_v26 = vadd.f32 %v646_v20, %v548_v51  ;;  %v530_v27 = vmul.f32 %v1114_v55, %v1683_v39  ;;  %v693_v42 = vmul.f32 %v1773_v16, %v1695_v44 }
  0xac   : > { %866 = vmatpush.msra.mxu1 %v810_v23  ;;  %v609_v50 = vsel %vm594_vm7, %v578_v49, %v579_v3  ;;  %v610_v18 = vsel %vm594_vm7, %v577_v59, %v578_v49  ;;  %v758_v28 = vmul.f32 %v1700_v46, %v1814_v52  ;;  %v547_v41 = vmul.f32 %v1131_v37, %v1683_v39 }
  0xad   : > { %v645_v33 = vmul.f32 %v1693_v43, %v609_v50  ;;  %v777_v55 = vmul.f32 %v1700_v46, %v609_v50  ;;  %v791_v11 = vadd.f32 %v759_v8, %v726_v30  ;;  %v644_v16 = vmul.f32 %v1693_v43, %v610_v18  ;;  %v950_v50 = vld [vmem:[%s357_s6] sm:$0xff] }
  0xae   : > { %v743_v34 = vadd.f32 %v711_v17, %v678_v26  ;;  %v776_v35 = vmul.f32 %v1700_v46, %v610_v18  ;;  %v660_v31 = vadd.f32 %v628_v61, %v530_v27  ;;  %v710_v15 = vmul.f32 %v1723_v54, %v1695_v44 }
  0xaf   : > { %v809_v59 = vadd.f32 %v777_v55, %v744_v62  ;;  %849 = vmatpush.msra.mxu0 %v791_v11  ;;  %v677_v6 = vadd.f32 %v645_v33, %v547_v41  ;;  %v775_v52 = vmul.f32 %v1700_v46, %v1749_v2  ;;  %v546_v38 = vmul.f32 %v1130_v13, %v1683_v39 }
  0xb0   : > { %v808_v4 = vadd.f32 %v776_v35, %v743_v34  ;;  %v725_v12 = vadd.f32 %v693_v42, %v660_v31  ;;  %v709_v43 = vmul.f32 %v1720_v53, %v1695_v44  ;;  %v774_v25 = vmul.f32 %v1700_v46, %v1741_v0  ;;  %v832_v53 = vld.sshfl [vmem:[#allocation1 + $0x8] sm:$0xff pattern:$0x75316420]  ;;  %v878_v46 = vld [vmem:[%s2214_s5] sm:$0xff] }
  0xb1   : > { %867 = vmatpush.msra.mxu1 %v809_v59  ;;  %v742_v56 = vadd.f32 %v710_v15, %v677_v6  ;;  %v676_v54 = vadd.f32 %v644_v16, %v546_v38  ;;  %v1462_v2 = vmov 0   ;;  %v879_v0 = vld [vmem:[%s2214_s5 + $0x8] sm:$0xff]  ;;  %vm897_vm7 = vcmask 1043456  }
  0xb2   : > { %v790_v58 = vadd.f32 %v758_v28, %v725_v12  ;;  %1267 = vset.pattern.permute.xlu0 %v1462_v2  ;;  %1268 = vset.pattern.permute.xlu1 %v1462_v2  ;;  %vm890_vm13 = vcmask 31744  }
  0xb3   : > { %868 = vmatpush.msra.mxu1 %v808_v4  ;;  %v807_v39 = vadd.f32 %v775_v52, %v742_v56  ;;  %v741_v47 = vadd.f32 %v709_v43, %v676_v54  ;;  %826 = vperm.xlu0 %1267, %v823_v45  }
  0xb4   : > { %850 = vmatpush.msra.mxu0 %v790_v58  ;;  %887 = vperm.xlu1 %1268, %v879_v0  }
  0xb5   : > { %869 = vmatpush.msra.mxu1 %v807_v39  ;;  %851 = vmatmul.f32.vlgmr.msra.gmra.mxu0 %v831_v60  ;;  %v806_v44 = vadd.f32 %v774_v25, %v741_v47 }
  0xb7   : > { %870 = vmatpush.msra.mxu1 %v806_v44 }
  0xb8   : > { %871 = vmatmul.f32.vlgmr.msra.gmra.mxu1 %v832_v53 }
  0xbb   : > { %882 = vperm.xlu0 %1267, %v878_v46  }
 0x125   : > { %v827_v29 = vpop.permute.xlu0 %826 }
 0x126   : > { %v888_v36 = vpop.permute.xlu1 %887 }
 0x12d   : > { %v883_v32 = vpop.permute.xlu0 %882 }
 0x132   : > { %v852_v40 = vpop.f32.mrf.mxu0 }
 0x133   : > { %v853_v37 = vadd.f32 %v852_v40, %v827_v29 }
 0x135   : > { %v872_v61 = vpop.f32.mrf.mxu1 }
 0x136   : > { %v873_v1 = vadd.f32 %v872_v61, %v853_v37 }
 0x138   : > { %v875_v3 = vmax.f32 %v873_v1, 0.0 }
 0x13a   : > { %1146 = vmatpush.msk.msra.mxu2 %vm897_vm7, %v875_v3 }
 0x13b   : > { %1147 = vmatmul.msk.f32.vlgmr.msra.gmra.mxu2 %vm890_vm13, %v876_v9 }
 0x143   : > { %1148 = vmatmul.msk.f32.gmra.mxu2 %vm890_vm13, %v877_v7 }
 0x1be   : > { %v918_v5 = vpop.f32.mrf.mxu2 }
 0x1bf   : > { %v919_v10 = vadd.f32 %v918_v5, %v883_v32 }
 0x1c6   : > { %v921_v24 = vpop.f32.mrf.mxu2 }
 0x1c7   : > { %v922_v48 = vadd.f32 %v921_v24, %v888_v36 }
 0x1c9   : > { %v924_v19 = vmax.f32 %v919_v10, %v922_v48 }
 0x1cb   : > { %v925_v14 = vrot.slane %v924_v19, 4 }
 0x1cd   : > { %v926_v8 = vmax.f32 %v924_v19, %v925_v14 }
 0x1cf   : > { %v927_v20 = vrot.slane %v926_v8, 2 }
 0x1d1   : > { %v928_v21 = vmax.f32 %v926_v8, %v927_v20 }
 0x1d3   : > { %v929_v57 = vrot.slane %v928_v21, 1 }
 0x1d5   : > { %v930_v22 = vmax.f32 %v928_v21, %v929_v57 }
 0x1d7   : > { %v1149_v13 = vmul.f32 -1.442695, %v930_v22 }
 0x1d9   : > { %1269 = vpow2.f32 %v1149_v13 }
 0x1df   : > { %v1270_v63 = vpop.eup %1269 }
 0x1e0   : > { %v934_v51 = vadd.f32 1.0, %v1270_v63 }
 0x1e2   : > { %1271 = vrcp.f32 %v934_v51  ;;  %v946_v17 = vand.u32 2147483648, %v934_v51  ;;  %v944_v26 = vand.u32 2147483647, %v934_v51  ;;  %vm940_vm15 = vweird.f32 %v934_v51 }
 0x1e4   : > { %v947_v42 = vor.u32 1.1754944e-38, %v946_v17  ;;  %vm945_vm1 = vcmp.eq.f32.partialorder %v944_v26, 8.507059e+37 }
 0x1e8   : > { %v1272_v23 = vpop.eup %1271 }
 0x1e9   : > { %v936_v49 = vmul.f32 %v1272_v23, %v934_v51  ;;  %vm941_vm14 = vweird.f32 %v1272_v23 }
 0x1ea   : > { %vm942_vm0 = vmor %vm940_vm15, %vm941_vm14 }
 0x1eb   : > { %v937_v62 = vsub.f32 1.0, %v936_v49 }
 0x1ed   : > { %v938_v30 = vmul.f32 %v1272_v23, %v937_v62 }
 0x1ef   : > { %v939_v27 = vadd.f32 %v1272_v23, %v938_v30 }
 0x1f1   : > { %v943_v18 = vsel %vm942_vm0, %v1272_v23, %v939_v27 }
 0x1f2   : > { %v948_v28 = vsel %vm945_vm1, %v947_v42, %v943_v18 }
 0x1f3   : > { %v951_v41 = vmul.f32 %v950_v50, %v948_v28 }
 0x1f5   : > { %952 = vst [vmem:[%s349_s10] sm:$0xff] %v951_v41 }
 0x1f6   : > { %1360 = shalt.err (!%p1357_p12)
}
 0x1f7   : > { %1162 = dma.vmem_to_hbm [thread:$0]  (%p1586_p9), %s969_s17, 128, %s971_s8, %s954_s16  }
 0x1f8 PF: > { %s2239_s15 = sld [smem:[#allocation11_spill]]  ;;  %p1176_p3 = scmp.ge.s32.totalorder %s1459_s7, 2 }
 0x1fa   : > { %p1172_p1 = pnand %p1176_p3, %p1592_p13 }
 0x1fc   : > { %p1173_p11 = pneg %p1172_p1 }
 0x1fe   : > { %s982_s11 = sand.u32 1, %s2239_s15  }
 0x1ff   : > { %s983_s28 = scalar_lea.sflag [#allocation4], %s982_s11 }
 0x200   : > { %1414 = dma.done.wait (%p1173_p11), %s983_s28, 128  }
 0x201   : > { %1416 = vsyncadd (%p1173_p11), %s983_s28, 4294967168  ;;  %s25_s7 = sadd.s32 1, %s1459_s7   ;;  %s2241_s27 = sld [smem:[#allocation16_spill]] }
 0x202   : > { %p22_p2 = scmp.ge.s32.totalorder %s25_s7, 6   ;;  %s2242_s10 = sld [smem:[#allocation12_spill]] }
 0x203   : > { %s2243_s17 = sld [smem:[#allocation13_spill]]  ;;  %s2244_s21 = smov %s1423_s22 }
 0x204   : > { %s2245_s22 = smov %s1427_s23  ;;  %s2246_s23 = smov %s1619_s20 }
 0x205   : > { %s2247_s24 = smov %s1435_s25  ;;  %s2248_s25 = smov %s1439_s26 }
 0x206   : > { %s2251_s28 = smov %s1455_s30  ;;  %24 = sbr.rel (!%p22_p2) target bundleno = 13 (0xd), region = 105 }
 0x207   : > { %s2249_s26 = smov %s2241_s27  ;;  %s2250_s27 = smov %s1451_s29 }
 0x208   : > { %s2252_s29 = smov %s2242_s10 }
 0x209   : > { %s2253_s30 = smov %s2243_s17 }
 0x20b   :  { %989 = vsyncpa [#allocation3], 1 }
 0x20c   :  { %991 = vsyncpa [#allocation3 + $0x1], 1 }
 0x20d   :  { %992 = vsyncpa [#allocation6], 1 }
 0x20e   :  { %994 = vsyncpa [#allocation6 + $0x1], 1 }
 0x20f   :  { %995 = vsyncpa [#allocation4], 1 }
 0x210   :  { %997 = vsyncpa [#allocation4 + $0x1], 1 }

// kernel: tpu_custom_call.1
= control target key start
LH: loop header
LB: loop body
LE: loop exit
PB: predicated region body
PF: predicated region fallthrough
CT: control target
= control target key end

     0   :  { %s2544_s0 = inlined_call_operand.hbm [shape: f32[2,2,256], index: 0, kind: input, shape index: {}]   ;;  %s2545_s1 = inlined_call_operand.hbm [shape: f32[2,4,256], index: 1, kind: input, shape index: {}]   ;;  %s2546_s2 = inlined_call_operand.vmem [shape: f32[2,8,256], index: 2, kind: input, shape index: {}]   ;;  %s2547_s3 = inlined_call_operand.vmem [shape: f32[4,1], index: 3, kind: input, shape index: {}]   ;;  %s2548_s4 = inlined_call_operand.vmem [shape: f32[16,4], index: 4, kind: input, shape index: {}]   ;;  %s2549_s5 = inlined_call_operand.vmem [shape: f32[16,1], index: 5, kind: input, shape index: {}]   ;;  %s2550_s6 = inlined_call_operand.hbm [shape: f32[2,8,256], index: 6, kind: output, shape index: {}]  }
   0x1   :  { %2558 = sst [smem:[#allocation17_spill]] %s2550_s6 }
   0x2   :  { %11 = vsyncpa [#allocation3], 0 }
   0x3   :  { %13 = vsyncpa [#allocation3 + $0x1], 0 }
   0x4   :  { %14 = vsyncpa [#allocation6], 0 }
   0x5   :  { %16 = vsyncpa [#allocation6 + $0x1], 0 }
   0x6   :  { %17 = vsyncpa [#allocation4], 0 }
   0x7   :  { %19 = vsyncpa [#allocation4 + $0x1], 0  ;;  %s1811_s21 = smov 0   ;;  %s1813_s22 = smov 0  }
   0x8   :  { %s1815_s23 = smov 0   ;;  %s1817_s24 = smov 0  }
   0x9   :  { %s1819_s25 = smov 0   ;;  %s1821_s26 = smov 0  }
   0xa   :  { %s1823_s27 = smov 0   ;;  %s1825_s28 = smov 0  }
   0xb   :  { %s1827_s29 = smov 0   ;;  %s1829_s30 = smov 0  }
   0xc   :  { %s1831_s7 = smov 0  }
   0xd LB: > { %2559 = sst [smem:[#allocation11_spill]] %s1744_s24  ;;  %s1314_s8 = sadd.s32 4294967295, %s1772_s7   ;;  %s1772_s7 = sphi %s1831_s7, %s25_s7   ;;  %s1768_s30 = sphi %s1829_s30, %s2588_s30   ;;  %s1764_s29 = sphi %s1827_s29, %s2587_s29   ;;  %s1760_s28 = sphi %s1825_s28, %s2586_s28   ;;  %s1756_s27 = sphi %s1823_s27, %s2585_s27   ;;  %s1752_s26 = sphi %s1821_s26, %s2584_s26   ;;  %s1748_s25 = sphi %s1819_s25, %s2583_s25   ;;  %s1744_s24 = sphi %s1817_s24, %s2582_s24   ;;  %s1740_s23 = sphi %s1815_s23, %s2581_s23   ;;  %s1736_s22 = sphi %s1813_s22, %s2580_s22   ;;  %s1732_s21 = sphi %s1811_s21, %s2579_s21  }
   0xe   : > { %s1315_s9 = sadd.s32 4294967294, %s1772_s7   ;;  %s34_s10 = sadd.s32 1, %s1764_s29 }
   0xf   : > { %s37_s11 = sadd.s32 1, %s1768_s30  ;;  %p35_p0 = scmp.ge.s32.totalorder %s34_s10, 2 }
  0x10   : > { %s46_s12 = sadd.s32 1, %s1752_s26  ;;  %p53_p1 = scmp.ne.s32.totalorder %s1752_s26, %s1748_s25 }
  0x11   : > { %p54_p2 = scmp.eq.s32.totalorder %s1772_s7, 0  ;;  %s2590_s10 = smov (%p35_p0, %s34_s10), 0 }
  0x12   : > { %2560 = sst [smem:[#allocation12_spill]] %s2590_s10  ;;  %s2592_s11 = smov (!%p35_p0, %s37_s11), %s1768_s30 }
  0x13   : > { %s42_s13 = ssub.s32 %s1764_s29, %s2590_s10  ;;  %p1881_p3 = por %p54_p2, %p53_p1 }
  0x14   : > { %p39_p4 = scmp.ge.s32.totalorder %s2592_s11, 2  ;;  %p59_p5 = scmp.ne.s32.totalorder %s1748_s25, %s1744_s24 }
  0x15   : > { %p1887_p6 = scmp.eq.s32.totalorder %s1314_s8, 0  ;;  %p202_p7 = scmp.eq.s32.totalorder %s1314_s8, 3 }
  0x16   : > { %s2594_s11 = smov (%p39_p4, %s2592_s11), 0  ;;  %p208_p10 = scmp.eq.s32.totalorder %s1315_s9, 3 }
  0x17   : > { %2563 = sst [smem:[#allocation13_spill]] %s2594_s11  ;;  %p1895_p8 = por %p1887_p6, %p59_p5 }
  0x18   : > { %p1899_p9 = por %p202_p7, %p53_p1  ;;  %s41_s18 = ssub.s32 %s1768_s30, %s2594_s11 }
  0x19   : > { %s43_s19 = sor.u32 %s42_s13, %s41_s18  ;;  %p70_p11 = scmp.eq.s32.totalorder %s41_s18, 0 }
  0x1a   : > { %s2565_s17 = scalar_select %p1899_p9, 1, 0 }
  0x1b   : > { %p44_p12 = scmp.eq.s32.totalorder %s43_s19, 0  ;;  %p1905_p13 = por %p208_p10, %p59_p5 }
  0x1c   : > { %2566 = sst [smem:[#allocation14_spill]] %s2565_s17  ;;  %p1488_p0 = scmp.lt.s32.totalorder %s1772_s7, 4 }
  0x1d   : > { %s2567_s20 = scalar_select %p1905_p13, 1, 0 }
  0x1e   : > { %s1911_s8 = scalar_select %p44_p12, %s1752_s26, %s46_s12  }
  0x1f   : > { %2568 = sst [smem:[#allocation15_spill]] %s2567_s20  ;;  %s237_s10 = sand.u32 1, %s1752_s26  }
  0x20   : > { %2569 = sst [smem:[#allocation16_spill]] %s1911_s8  ;;  %s1319_s24 = sshll.u32 %s1768_s30, 1 }
  0x21   : > { %s1318_s17 = sshll.u32 %s237_s10, 1  ;;  %s245_s9 = sadd.s32 %s1764_s29, %s1319_s24 }
  0x22   : > { %s1320_s13 = sshll.u32 %s245_s9, 1  ;;  %s241_s19 = scalar_lea.vmem [#allocation2], %s1318_s17 }
  0x23   : > { %s251_s11 = sshll.u32 %s241_s19, 4  ;;  %s247_s12 = scalar_lea.hbm %s2544_s0, %s1320_s13  ;;  %s252_s11 = int_to_ptr.vmem [resolvable:$true] %s251_s11 }
  0x24   : > { %s249_s8 = sshll.u32 %s247_s12, 4  ;;  %p1478_p1 = pnand %p1488_p0, %p1881_p3  ;;  %s250_s8 = int_to_ptr.hbm [resolvable:$true] %s249_s8 }
  0x25   : > { %p1324_p4 = scmp.ge.s32.totalorder %s1772_s7, 1  ;;  %p287_p5 = scmp.lt.s32.totalorder %s1772_s7, 5 }
  0x26   : > { %s238_s24 = scalar_lea.sflag [#allocation3], %s237_s10  ;;  %s72_s6 = sadd.s32 1, %s1740_s23 }
  0x27   : > { %1480 = dma.hbm_to_vmem [thread:$0]  (!%p1478_p1), %s250_s8, 32, %s252_s11, %s238_s24  }
  0x28   : > { %p1925_p7 = pnand %p1324_p4, %p287_p5  ;;  %p79_p10 = scmp.ne.s32.totalorder %s1740_s23, %s1736_s22 }
  0x29   : > { %s1932_s20 = scalar_select %p70_p11, %s1740_s23, %s72_s6  }
  0x2a   : > { %p85_p12 = scmp.ne.s32.totalorder %s1736_s22, %s1732_s21  ;;  %s258_s9 = sand.u32 1, %s1740_s23  }
  0x2b   : > { %s1468_s14 = sshll.u32 %s1768_s30, 3  ;;  %p81_p1 = por %p79_p10, %p54_p2 }
  0x2c   : > { %p1942_p3 = por %p85_p12, %p1887_p6  ;;  %s1321_s10 = sshll.u32 %s258_s9, 3 }
  0x2d   : > { %s267_s19 = scalar_lea.hbm %s2545_s1, %s1468_s14  ;;  %s262_s18 = scalar_lea.vmem [#allocation5], %s1321_s10 }
  0x2e   : > { %s269_s12 = sshll.u32 %s267_s19, 4  ;;  %s271_s24 = sshll.u32 %s262_s18, 4  ;;  %s270_s12 = int_to_ptr.hbm [resolvable:$true] %s269_s12  ;;  %s272_s24 = int_to_ptr.vmem [resolvable:$true] %s271_s24 }
  0x2f   : > { %p1481_p11 = pnand %p1488_p0, %p81_p1  ;;  %s259_s21 = scalar_lea.sflag [#allocation6], %s258_s9 }
  0x30   : > { %291 = sbr.rel (%p1925_p7) target bundleno = 530 (0x212), region = 44  ;;  %s1956_s15 = sand.u32 (!%p1925_p7), 1, %s1748_s25  }
  0x31   : > { %1483 = dma.hbm_to_vmem [thread:$0]  (!%p1481_p11), %s270_s12, 128, %s272_s24, %s259_s21  }
  0x32   : > { %s1325_s6 = sshll.u32 (!%p1925_p7), %s1956_s15, 1  ;;  %s294_s14 = scalar_lea.sflag (!%p1925_p7), [#allocation3], %s1956_s15 }
  0x33   : > { %s297_s11 = scalar_lea.vmem (!%p1925_p7), [#allocation2], %s1325_s6 }
  0x35   : > { %1719 = dma.done.wait (%p1895_p8), %s294_s14, 32  }
  0x36   : > { %1721 = vsyncadd (%p1895_p8), %s294_s14, 4294967264  ;;  %s303_s9 = sand.u32 1, %s1736_s22  }
  0x37   : > { %s1965_s10 = sshll.u32 %s303_s9, 3  ;;  %s304_s17 = scalar_lea.sflag [#allocation6], %s303_s9 }
  0x38   : > { %s307_s8 = scalar_lea.vmem [#allocation5], %s1965_s10 }
  0x39   : > { %1723 = dma.done.wait (%p1942_p3), %s304_s17, 128  }
  0x3a   : > { %1725 = vsyncadd (%p1942_p3), %s304_s17, 4294967168  ;;  %v358_v0 = vld [vmem:[%s297_s11] sm:$0x3]  ;;  %v387_v2 = vlaneseq  ;;  %v1774_v41 = vmov 0.0   ;;  %p350_p2 = scmp.lt.s32.totalorder %s1760_s28, 1  ;;  %p352_p6 = scmp.lt.s32.totalorder %s1756_s27, 1 }
  0x3b   : > { %v359_v1 = vadd.f32 1.0, %v358_v0  ;;  %s1327_s19 = sshll.u32 %s1956_s15, 3 }
  0x3c   : > { %v1972_v5 = vshrl.u32 %v387_v2, 7  ;;  %s351_s9 = scalar_select %p350_p2, %s1760_s28, 1 }
  0x3d   : > { %v360_v3 = vmul.f32 8.0, %v359_v1  ;;  %s353_s10 = scalar_select %p352_p6, %s1756_s27, 1 }
  0x3e   : > { %v403_v9 = vadd.s32 120, %v1972_v5  ;;  %v402_v13 = vadd.s32 112, %v1972_v5  ;;  %v1977_v15 = vadd.s32 248, %v1972_v5  ;;  %v1980_v16 = vadd.s32 104, %v1972_v5  ;;  %s1328_s17 = sshll.u32 %s351_s9, 1  ;;  %s2572_s9 = sld [smem:[#allocation17_spill]] }
  0x3f   : > { %v1330_v4 = vadd.f32 -0.5, %v360_v3  ;;  %v1983_v17 = vadd.s32 240, %v1972_v5  ;;  %v1986_v21 = vadd.s32 96, %v1972_v5  ;;  %v1989_v23 = vadd.s32 232, %v1972_v5  ;;  %s355_s16 = sadd.s32 %s1328_s17, %s353_s10  ;;  %s349_s10 = scalar_lea.vmem [#allocation7], %s1327_s19 }
  0x40   : > { %v1992_v24 = vadd.s32 88, %v1972_v5  ;;  %v1995_v25 = vadd.s32 224, %v1972_v5  ;;  %v2000_v33 = vadd.s32 80, %v1972_v5  ;;  %s1329_s12 = sshll.u32 %s355_s16, 3  ;;  %s1185_s17 = sshll.u32 %s349_s10, 4  ;;  %s1186_s17 = int_to_ptr.vmem [resolvable:$true] %s1185_s17 }
  0x41   : > { %v362_v6 = vfloor.f32 %v1330_v4  ;;  %s357_s6 = scalar_lea.vmem %s2546_s2, %s1329_s12  ;;  %s1171_s16 = scalar_lea.sflag [#allocation4], %s1956_s15 }
  0x43   : > { %v363_v7 = vsub.f32 %v1330_v4, %v362_v6  ;;  %v1470_v8 = vcvt.f32.s32 %v362_v6 }
  0x44   : > { %s1666_s19 = scalar_lea.hbm %s2572_s9, 32 }
  0x45   : > { %v364_v10 = vsub.f32 1.0, %v363_v7  ;;  %vm366_vm0 = vcmp.ge.s32.totalorder %v1470_v8, 0  ;;  %vm367_vm1 = vcmp.le.s32.totalorder %v1470_v8, 15  ;;  %vm370_vm2 = vcmp.ge.s32.totalorder %v1470_v8, 4294967295 }
  0x46   : > { %vm368_vm3 = vmand %vm366_vm0, %vm367_vm1  ;;  %vm371_vm4 = vcmp.le.s32.totalorder %v1470_v8, 14  ;;  %v384_v11 = vmul.u32 16, %v1470_v8  ;;  %v385_v12 = vrot.slane %v1470_v8, 7 }
  0x47   : > { %v369_v14 = vsel %vm368_vm3, %v364_v10, 0.0  ;;  %vm372_vm5 = vmand %vm370_vm2, %vm371_vm4 }
  0x48   : > { %v373_v18 = vsel %vm372_vm5, %v363_v7, 0.0  ;;  %v375_v19 = vrot.slane %v369_v14, 7  ;;  %v386_v20 = vadd.s32 %v385_v12, %v384_v11 }
  0x49   : > { %v379_v22 = vrot.slane %v373_v18, 7 }
  0x4a   : > { %v377_v26 = vmul.f32 %v375_v19, %v369_v14  ;;  %v382_v27 = vmul.f32 %v375_v19, %v373_v18  ;;  %v1997_v28 = vperm.slane %v386_v20, 1  ;;  %v550_v29 = vadd.s32 1, %v386_v20 }
  0x4b   : > { %v381_v30 = vmul.f32 %v379_v22, %v369_v14  ;;  %v383_v31 = vmul.f32 %v379_v22, %v373_v18  ;;  %v713_v32 = vadd.s32 16, %v386_v20 }
  0x4c   : > { %v2002_v34 = vperm.slane %v377_v26, 1  ;;  %v2004_v35 = vperm.slane %v550_v29, 1  ;;  %v2006_v36 = vperm.slane %v382_v27, 1  ;;  %vm436_vm6 = vcmp.eq.s32.totalorder %v403_v9, %v1997_v28 }
  0x4d   : > { %v2009_v37 = vperm.slane %v381_v30, 1  ;;  %v2011_v38 = vperm.slane %v713_v32, 1  ;;  %v876_v39 = vadd.s32 1, %v713_v32  ;;  %v2013_v40 = vperm.slane %v383_v31, 1 }
  0x4e   : > { %v1346_v42 = vsel %vm436_vm6, 1.0, %v1774_v41  ;;  %vm567_vm7 = vcmp.eq.s32.totalorder %v403_v9, %v2004_v35  ;;  %vm435_vm8 = vcmp.eq.s32.totalorder %v402_v13, %v1997_v28  ;;  %vm566_vm9 = vcmp.eq.s32.totalorder %v402_v13, %v2004_v35 }
  0x4f   : > { %v2019_v43 = vperm.slane %v876_v39, 1  ;;  %v533_v44 = vmul.f32 %v1346_v42, %v2002_v34  ;;  %v1378_v45 = vsel %vm567_vm7, 1.0, %v1774_v41  ;;  %vm730_vm10 = vcmp.eq.s32.totalorder %v403_v9, %v2011_v38 }
  0x50   : > { %v664_v46 = vmul.f32 %v1378_v45, %v2009_v37  ;;  %v1410_v47 = vsel %vm730_vm10, 1.0, %v1774_v41  ;;  %v1345_v48 = vsel %vm435_vm8, 1.0, %v1774_v41  ;;  %v1377_v49 = vsel %vm566_vm9, 1.0, %v1774_v41 }
  0x51   : > { %v827_v50 = vmul.f32 %v1410_v47, %v2006_v36  ;;  %vm893_vm11 = vcmp.eq.s32.totalorder %v403_v9, %v2019_v43  ;;  %v532_v51 = vmul.f32 %v1345_v48, %v2002_v34  ;;  %v663_v52 = vmul.f32 %v1377_v49, %v2009_v37 }
  0x52   : > { %v696_v53 = vadd.f32 %v664_v46, %v533_v44  ;;  %v1442_v54 = vsel %vm893_vm11, 1.0, %v1774_v41  ;;  %vm729_vm12 = vcmp.eq.s32.totalorder %v402_v13, %v2011_v38  ;;  %vm892_vm13 = vcmp.eq.s32.totalorder %v402_v13, %v2019_v43 }
  0x53   : > { %v990_v55 = vmul.f32 %v1442_v54, %v2013_v40  ;;  %v695_v56 = vadd.f32 %v663_v52, %v532_v51  ;;  %v1409_v57 = vsel %vm729_vm12, 1.0, %v1774_v41  ;;  %v1441_v58 = vsel %vm892_vm13, 1.0, %v1774_v41 }
  0x54   : > { %v859_v59 = vadd.f32 %v827_v50, %v696_v53  ;;  %v826_v60 = vmul.f32 %v1409_v57, %v2006_v36  ;;  %v989_v61 = vmul.f32 %v1441_v58, %v2013_v40  ;;  %vm452_vm14 = vcmp.eq.s32.totalorder %v1977_v15, %v1997_v28 }
  0x55   : > { %v1362_v62 = vsel %vm452_vm14, 1.0, %v1774_v41  ;;  %vm583_vm15 = vcmp.eq.s32.totalorder %v1977_v15, %v2004_v35  ;;  %vm746_vm0 = vcmp.eq.s32.totalorder %v1977_v15, %v2011_v38  ;;  %vm909_vm1 = vcmp.eq.s32.totalorder %v1977_v15, %v2019_v43 }
  0x56   : > { %v1022_v63 = vadd.f32 %v990_v55, %v859_v59  ;;  %v858_v0 = vadd.f32 %v826_v60, %v695_v56  ;;  %v549_v1 = vmul.f32 %v1362_v62, %v2002_v34  ;;  %v1394_v2 = vsel %vm583_vm15, 1.0, %v1774_v41 }
  0x57   : > { %v680_v3 = vmul.f32 %v1394_v2, %v2009_v37  ;;  %v1426_v4 = vsel %vm746_vm0, 1.0, %v1774_v41  ;;  %v1458_v6 = vsel %vm909_vm1, 1.0, %v1774_v41  ;;  %vm434_vm2 = vcmp.eq.s32.totalorder %v1980_v16, %v1997_v28 }
  0x58   : > { %1052 = vmatpush.msra.mxu0 %v1022_v63  ;;  %v1021_v7 = vadd.f32 %v989_v61, %v858_v0  ;;  %v843_v8 = vmul.f32 %v1426_v4, %v2006_v36  ;;  %v1006_v9 = vmul.f32 %v1458_v6, %v2013_v40  ;;  %v1344_v10 = vsel %vm434_vm2, 1.0, %v1774_v41 }
  0x59   : > { %v712_v11 = vadd.f32 %v680_v3, %v549_v1  ;;  %v531_v12 = vmul.f32 %v1344_v10, %v2002_v34  ;;  %vm565_vm3 = vcmp.eq.s32.totalorder %v1980_v16, %v2004_v35  ;;  %vm728_vm4 = vcmp.eq.s32.totalorder %v1980_v16, %v2011_v38 }
  0x5a   : > { %1053 = vmatpush.msra.mxu0 %v1021_v7  ;;  %v1376_v13 = vsel %vm565_vm3, 1.0, %v1774_v41  ;;  %v1408_v14 = vsel %vm728_vm4, 1.0, %v1774_v41  ;;  %vm891_vm5 = vcmp.eq.s32.totalorder %v1980_v16, %v2019_v43  ;;  %vm451_vm6 = vcmp.eq.s32.totalorder %v1983_v17, %v1997_v28 }
  0x5b   : > { %v875_v15 = vadd.f32 %v843_v8, %v712_v11  ;;  %v662_v18 = vmul.f32 %v1376_v13, %v2009_v37  ;;  %v825_v19 = vmul.f32 %v1408_v14, %v2006_v36  ;;  %v1440_v20 = vsel %vm891_vm5, 1.0, %v1774_v41 }
  0x5c   : > { %v988_v22 = vmul.f32 %v1440_v20, %v2013_v40  ;;  %v1361_v26 = vsel %vm451_vm6, 1.0, %v1774_v41  ;;  %vm582_vm7 = vcmp.eq.s32.totalorder %v1983_v17, %v2004_v35  ;;  %vm745_vm8 = vcmp.eq.s32.totalorder %v1983_v17, %v2011_v38 }
  0x5d   : > { %v1038_v16 = vadd.f32 %v1006_v9, %v875_v15  ;;  %v694_v27 = vadd.f32 %v662_v18, %v531_v12  ;;  %v548_v29 = vmul.f32 %v1361_v26, %v2002_v34  ;;  %v1393_v30 = vsel %vm582_vm7, 1.0, %v1774_v41 }
  0x5e   : > { %v679_v31 = vmul.f32 %v1393_v30, %v2009_v37  ;;  %v1425_v32 = vsel %vm745_vm8, 1.0, %v1774_v41  ;;  %vm908_vm9 = vcmp.eq.s32.totalorder %v1983_v17, %v2019_v43  ;;  %vm433_vm10 = vcmp.eq.s32.totalorder %v1986_v21, %v1997_v28 }
  0x5f   : > { %1072 = vmatpush.msra.mxu1 %v1038_v16  ;;  %v857_v39 = vadd.f32 %v825_v19, %v694_v27  ;;  %v842_v42 = vmul.f32 %v1425_v32, %v2006_v36  ;;  %v1457_v44 = vsel %vm908_vm9, 1.0, %v1774_v41  ;;  %v1343_v45 = vsel %vm433_vm10, 1.0, %v1774_v41 }
  0x60   : > { %v711_v46 = vadd.f32 %v679_v31, %v548_v29  ;;  %v1005_v47 = vmul.f32 %v1457_v44, %v2013_v40  ;;  %v530_v48 = vmul.f32 %v1343_v45, %v2002_v34  ;;  %vm564_vm11 = vcmp.eq.s32.totalorder %v1986_v21, %v2004_v35 }
  0x61   : > { %v1020_v17 = vadd.f32 %v988_v22, %v857_v39  ;;  %v1375_v49 = vsel %vm564_vm11, 1.0, %v1774_v41  ;;  %vm727_vm12 = vcmp.eq.s32.totalorder %v1986_v21, %v2011_v38  ;;  %vm890_vm13 = vcmp.eq.s32.totalorder %v1986_v21, %v2019_v43 }
  0x62   : > { %v874_v50 = vadd.f32 %v842_v42, %v711_v46  ;;  %v661_v51 = vmul.f32 %v1375_v49, %v2009_v37  ;;  %v1407_v52 = vsel %vm727_vm12, 1.0, %v1774_v41  ;;  %v1439_v53 = vsel %vm890_vm13, 1.0, %v1774_v41 }
  0x63   : > { %1054 = vmatpush.msra.mxu0 %v1020_v17  ;;  %v824_v54 = vmul.f32 %v1407_v52, %v2006_v36  ;;  %v987_v55 = vmul.f32 %v1439_v53, %v2013_v40  ;;  %vm450_vm14 = vcmp.eq.s32.totalorder %v1989_v23, %v1997_v28  ;;  %vm581_vm15 = vcmp.eq.s32.totalorder %v1989_v23, %v2004_v35 }
  0x64   : > { %v1037_v56 = vadd.f32 %v1005_v47, %v874_v50  ;;  %v693_v21 = vadd.f32 %v661_v51, %v530_v48  ;;  %v1360_v57 = vsel %vm450_vm14, 1.0, %v1774_v41  ;;  %v1392_v58 = vsel %vm581_vm15, 1.0, %v1774_v41 }
  0x65   : > { %v547_v59 = vmul.f32 %v1360_v57, %v2002_v34  ;;  %v678_v60 = vmul.f32 %v1392_v58, %v2009_v37  ;;  %vm744_vm0 = vcmp.eq.s32.totalorder %v1989_v23, %v2011_v38  ;;  %vm907_vm1 = vcmp.eq.s32.totalorder %v1989_v23, %v2019_v43 }
  0x66   : > { %1073 = vmatpush.msra.mxu1 %v1037_v56  ;;  %v856_v61 = vadd.f32 %v824_v54, %v693_v21  ;;  %v1424_v62 = vsel %vm744_vm0, 1.0, %v1774_v41  ;;  %v1456_v63 = vsel %vm907_vm1, 1.0, %v1774_v41  ;;  %vm432_vm2 = vcmp.eq.s32.totalorder %v1992_v24, %v1997_v28 }
  0x67   : > { %v710_v0 = vadd.f32 %v678_v60, %v547_v59  ;;  %v841_v1 = vmul.f32 %v1424_v62, %v2006_v36  ;;  %v1004_v2 = vmul.f32 %v1456_v63, %v2013_v40  ;;  %v1342_v3 = vsel %vm432_vm2, 1.0, %v1774_v41 }
  0x68   : > { %v1019_v4 = vadd.f32 %v987_v55, %v856_v61  ;;  %v529_v6 = vmul.f32 %v1342_v3, %v2002_v34  ;;  %vm563_vm3 = vcmp.eq.s32.totalorder %v1992_v24, %v2004_v35  ;;  %vm726_vm4 = vcmp.eq.s32.totalorder %v1992_v24, %v2011_v38 }
  0x69   : > { %v873_v23 = vadd.f32 %v841_v1, %v710_v0  ;;  %v1374_v7 = vsel %vm563_vm3, 1.0, %v1774_v41  ;;  %v1406_v8 = vsel %vm726_vm4, 1.0, %v1774_v41  ;;  %vm889_vm5 = vcmp.eq.s32.totalorder %v1992_v24, %v2019_v43 }
  0x6a   : > { %1055 = vmatpush.msra.mxu0 %v1019_v4  ;;  %v660_v9 = vmul.f32 %v1374_v7, %v2009_v37  ;;  %v823_v10 = vmul.f32 %v1406_v8, %v2006_v36  ;;  %v1438_v11 = vsel %vm889_vm5, 1.0, %v1774_v41  ;;  %vm449_vm6 = vcmp.eq.s32.totalorder %v1995_v25, %v1997_v28 }
  0x6b   : > { %v1036_v12 = vadd.f32 %v1004_v2, %v873_v23  ;;  %v986_v13 = vmul.f32 %v1438_v11, %v2013_v40  ;;  %v1359_v14 = vsel %vm449_vm6, 1.0, %v1774_v41  ;;  %vm580_vm7 = vcmp.eq.s32.totalorder %v1995_v25, %v2004_v35 }
  0x6c   : > { %v692_v15 = vadd.f32 %v660_v9, %v529_v6  ;;  %v546_v24 = vmul.f32 %v1359_v14, %v2002_v34  ;;  %v1391_v18 = vsel %vm580_vm7, 1.0, %v1774_v41  ;;  %vm743_vm8 = vcmp.eq.s32.totalorder %v1995_v25, %v2011_v38 }
  0x6d   : > { %1074 = vmatpush.msra.mxu1 %v1036_v12  ;;  %v677_v19 = vmul.f32 %v1391_v18, %v2009_v37  ;;  %v1423_v20 = vsel %vm743_vm8, 1.0, %v1774_v41  ;;  %vm906_vm9 = vcmp.eq.s32.totalorder %v1995_v25, %v2019_v43  ;;  %vm431_vm10 = vcmp.eq.s32.totalorder %v2000_v33, %v1997_v28 }
  0x6e   : > { %v855_v22 = vadd.f32 %v823_v10, %v692_v15  ;;  %v840_v26 = vmul.f32 %v1423_v20, %v2006_v36  ;;  %v1455_v16 = vsel %vm906_vm9, 1.0, %v1774_v41  ;;  %v1341_v27 = vsel %vm431_vm10, 1.0, %v1774_v41 }
  0x6f   : > { %v709_v29 = vadd.f32 %v677_v19, %v546_v24  ;;  %v1003_v30 = vmul.f32 %v1455_v16, %v2013_v40  ;;  %v528_v31 = vmul.f32 %v1341_v27, %v2002_v34  ;;  %vm562_vm11 = vcmp.eq.s32.totalorder %v2000_v33, %v2004_v35 }
  0x70   : > { %v1018_v32 = vadd.f32 %v986_v13, %v855_v22  ;;  %v1373_v25 = vsel %vm562_vm11, 1.0, %v1774_v41  ;;  %vm725_vm12 = vcmp.eq.s32.totalorder %v2000_v33, %v2011_v38  ;;  %vm888_vm13 = vcmp.eq.s32.totalorder %v2000_v33, %v2019_v43 }
  0x71   : > { %v872_v39 = vadd.f32 %v840_v26, %v709_v29  ;;  %v659_v42 = vmul.f32 %v1373_v25, %v2009_v37  ;;  %v1405_v44 = vsel %vm725_vm12, 1.0, %v1774_v41  ;;  %v1437_v45 = vsel %vm888_vm13, 1.0, %v1774_v41 }
  0x72   : > { %1056 = vmatpush.msra.mxu0 %v1018_v32  ;;  %v822_v46 = vmul.f32 %v1405_v44, %v2006_v36  ;;  %v985_v47 = vmul.f32 %v1437_v45, %v2013_v40  ;;  %v415_v48 = vadd.s32 216, %v1972_v5  ;;  %v397_v17 = vadd.s32 72, %v1972_v5 }
  0x73   : > { %v1035_v49 = vadd.f32 %v1003_v30, %v872_v39  ;;  %v691_v50 = vadd.f32 %v659_v42, %v528_v31  ;;  %v414_v33 = vadd.s32 208, %v1972_v5  ;;  %v396_v51 = vadd.s32 64, %v1972_v5 }
  0x74   : > { %vm448_vm14 = vcmp.eq.s32.totalorder %v415_v48, %v1997_v28  ;;  %vm579_vm15 = vcmp.eq.s32.totalorder %v415_v48, %v2004_v35  ;;  %vm742_vm0 = vcmp.eq.s32.totalorder %v415_v48, %v2011_v38  ;;  %vm905_vm1 = vcmp.eq.s32.totalorder %v415_v48, %v2019_v43 }
  0x75   : > { %1075 = vmatpush.msra.mxu1 %v1035_v49  ;;  %v854_v52 = vadd.f32 %v822_v46, %v691_v50  ;;  %v1358_v53 = vsel %vm448_vm14, 1.0, %v1774_v41  ;;  %v1390_v54 = vsel %vm579_vm15, 1.0, %v1774_v41  ;;  %v1422_v55 = vsel %vm742_vm0, 1.0, %v1774_v41 }
  0x76   : > { %v545_v56 = vmul.f32 %v1358_v53, %v2002_v34  ;;  %v676_v21 = vmul.f32 %v1390_v54, %v2009_v37  ;;  %v839_v57 = vmul.f32 %v1422_v55, %v2006_v36  ;;  %v1454_v58 = vsel %vm905_vm1, 1.0, %v1774_v41 }
  0x77   : > { %v1017_v59 = vadd.f32 %v985_v47, %v854_v52  ;;  %v1002_v60 = vmul.f32 %v1454_v58, %v2013_v40  ;;  %vm430_vm2 = vcmp.eq.s32.totalorder %v397_v17, %v1997_v28  ;;  %vm561_vm3 = vcmp.eq.s32.totalorder %v397_v17, %v2004_v35 }
  0x78   : > { %v708_v61 = vadd.f32 %v676_v21, %v545_v56  ;;  %v1340_v62 = vsel %vm430_vm2, 1.0, %v1774_v41  ;;  %v1372_v63 = vsel %vm561_vm3, 1.0, %v1774_v41  ;;  %vm724_vm4 = vcmp.eq.s32.totalorder %v397_v17, %v2011_v38 }
  0x79   : > { %1057 = vmatpush.msra.mxu0 %v1017_v59  ;;  %v527_v0 = vmul.f32 %v1340_v62, %v2002_v34  ;;  %v658_v1 = vmul.f32 %v1372_v63, %v2009_v37  ;;  %v1404_v2 = vsel %vm724_vm4, 1.0, %v1774_v41  ;;  %vm887_vm5 = vcmp.eq.s32.totalorder %v397_v17, %v2019_v43 }
  0x7a   : > { %v871_v3 = vadd.f32 %v839_v57, %v708_v61  ;;  %v821_v4 = vmul.f32 %v1404_v2, %v2006_v36  ;;  %v1436_v6 = vsel %vm887_vm5, 1.0, %v1774_v41  ;;  %vm447_vm6 = vcmp.eq.s32.totalorder %v414_v33, %v1997_v28 }
  0x7b   : > { %v690_v23 = vadd.f32 %v658_v1, %v527_v0  ;;  %v984_v7 = vmul.f32 %v1436_v6, %v2013_v40  ;;  %v1357_v8 = vsel %vm447_vm6, 1.0, %v1774_v41  ;;  %vm578_vm7 = vcmp.eq.s32.totalorder %v414_v33, %v2004_v35 }
  0x7c   : > { %v1034_v9 = vadd.f32 %v1002_v60, %v871_v3  ;;  %v544_v10 = vmul.f32 %v1357_v8, %v2002_v34  ;;  %v1389_v11 = vsel %vm578_vm7, 1.0, %v1774_v41  ;;  %vm741_vm8 = vcmp.eq.s32.totalorder %v414_v33, %v2011_v38 }
  0x7d   : > { %v853_v12 = vadd.f32 %v821_v4, %v690_v23  ;;  %v675_v13 = vmul.f32 %v1389_v11, %v2009_v37  ;;  %v1421_v14 = vsel %vm741_vm8, 1.0, %v1774_v41  ;;  %vm904_vm9 = vcmp.eq.s32.totalorder %v414_v33, %v2019_v43 }
  0x7e   : > { %1076 = vmatpush.msra.mxu1 %v1034_v9  ;;  %v838_v15 = vmul.f32 %v1421_v14, %v2006_v36  ;;  %v1453_v24 = vsel %vm904_vm9, 1.0, %v1774_v41  ;;  %vm429_vm10 = vcmp.eq.s32.totalorder %v396_v51, %v1997_v28  ;;  %vm560_vm11 = vcmp.eq.s32.totalorder %v396_v51, %v2004_v35 }
  0x7f   : > { %v1016_v18 = vadd.f32 %v984_v7, %v853_v12  ;;  %v707_v19 = vadd.f32 %v675_v13, %v544_v10  ;;  %v1001_v20 = vmul.f32 %v1453_v24, %v2013_v40  ;;  %v1339_v22 = vsel %vm429_vm10, 1.0, %v1774_v41 }
  0x80   : > { %v526_v26 = vmul.f32 %v1339_v22, %v2002_v34  ;;  %v1371_v16 = vsel %vm560_vm11, 1.0, %v1774_v41  ;;  %vm723_vm12 = vcmp.eq.s32.totalorder %v396_v51, %v2011_v38  ;;  %vm886_vm13 = vcmp.eq.s32.totalorder %v396_v51, %v2019_v43 }
  0x81   : > { %1058 = vmatpush.msra.mxu0 %v1016_v18  ;;  %v870_v27 = vadd.f32 %v838_v15, %v707_v19  ;;  %v657_v29 = vmul.f32 %v1371_v16, %v2009_v37  ;;  %v1403_v30 = vsel %vm723_vm12, 1.0, %v1774_v41  ;;  %v1435_v31 = vsel %vm886_vm13, 1.0, %v1774_v41 }
  0x82   : > { %v820_v32 = vmul.f32 %v1403_v30, %v2006_v36  ;;  %v983_v25 = vmul.f32 %v1435_v31, %v2013_v40  ;;  %v413_v39 = vadd.s32 200, %v1972_v5  ;;  %v395_v42 = vadd.s32 56, %v1972_v5 }
  0x83   : > { %v1033_v44 = vadd.f32 %v1001_v20, %v870_v27  ;;  %v689_v45 = vadd.f32 %v657_v29, %v526_v26  ;;  %v412_v46 = vadd.s32 192, %v1972_v5  ;;  %v394_v47 = vadd.s32 48, %v1972_v5 }
  0x84   : > { %vm446_vm14 = vcmp.eq.s32.totalorder %v413_v39, %v1997_v28  ;;  %vm577_vm15 = vcmp.eq.s32.totalorder %v413_v39, %v2004_v35  ;;  %vm740_vm0 = vcmp.eq.s32.totalorder %v413_v39, %v2011_v38  ;;  %vm903_vm1 = vcmp.eq.s32.totalorder %v413_v39, %v2019_v43 }
  0x85   : > { %1077 = vmatpush.msra.mxu1 %v1033_v44  ;;  %v852_v48 = vadd.f32 %v820_v32, %v689_v45  ;;  %v1356_v17 = vsel %vm446_vm14, 1.0, %v1774_v41  ;;  %v1388_v49 = vsel %vm577_vm15, 1.0, %v1774_v41  ;;  %v1420_v50 = vsel %vm740_vm0, 1.0, %v1774_v41 }
  0x86   : > { %v543_v33 = vmul.f32 %v1356_v17, %v2002_v34  ;;  %v674_v51 = vmul.f32 %v1388_v49, %v2009_v37  ;;  %v837_v52 = vmul.f32 %v1420_v50, %v2006_v36  ;;  %v1452_v53 = vsel %vm903_vm1, 1.0, %v1774_v41 }
  0x87   : > { %v1015_v54 = vadd.f32 %v983_v25, %v852_v48  ;;  %v1000_v55 = vmul.f32 %v1452_v53, %v2013_v40  ;;  %vm428_vm2 = vcmp.eq.s32.totalorder %v395_v42, %v1997_v28  ;;  %vm559_vm3 = vcmp.eq.s32.totalorder %v395_v42, %v2004_v35 }
  0x88   : > { %v706_v56 = vadd.f32 %v674_v51, %v543_v33  ;;  %v1338_v21 = vsel %vm428_vm2, 1.0, %v1774_v41  ;;  %v1370_v57 = vsel %vm559_vm3, 1.0, %v1774_v41  ;;  %vm722_vm4 = vcmp.eq.s32.totalorder %v395_v42, %v2011_v38 }
  0x89   : > { %1059 = vmatpush.msra.mxu0 %v1015_v54  ;;  %v525_v58 = vmul.f32 %v1338_v21, %v2002_v34  ;;  %v656_v59 = vmul.f32 %v1370_v57, %v2009_v37  ;;  %v1402_v60 = vsel %vm722_vm4, 1.0, %v1774_v41  ;;  %vm885_vm5 = vcmp.eq.s32.totalorder %v395_v42, %v2019_v43 }
  0x8a   : > { %v869_v61 = vadd.f32 %v837_v52, %v706_v56  ;;  %v819_v62 = vmul.f32 %v1402_v60, %v2006_v36  ;;  %v1434_v63 = vsel %vm885_vm5, 1.0, %v1774_v41  ;;  %vm445_vm6 = vcmp.eq.s32.totalorder %v412_v46, %v1997_v28 }
  0x8b   : > { %v688_v0 = vadd.f32 %v656_v59, %v525_v58  ;;  %v982_v1 = vmul.f32 %v1434_v63, %v2013_v40  ;;  %v1355_v2 = vsel %vm445_vm6, 1.0, %v1774_v41  ;;  %vm576_vm7 = vcmp.eq.s32.totalorder %v412_v46, %v2004_v35 }
  0x8c   : > { %v1032_v3 = vadd.f32 %v1000_v55, %v869_v61  ;;  %v542_v4 = vmul.f32 %v1355_v2, %v2002_v34  ;;  %v1387_v6 = vsel %vm576_vm7, 1.0, %v1774_v41  ;;  %vm739_vm8 = vcmp.eq.s32.totalorder %v412_v46, %v2011_v38 }
  0x8d   : > { %v851_v23 = vadd.f32 %v819_v62, %v688_v0  ;;  %v673_v7 = vmul.f32 %v1387_v6, %v2009_v37  ;;  %v1419_v8 = vsel %vm739_vm8, 1.0, %v1774_v41  ;;  %vm902_vm9 = vcmp.eq.s32.totalorder %v412_v46, %v2019_v43 }
  0x8e   : > { %1078 = vmatpush.msra.mxu1 %v1032_v3  ;;  %v836_v9 = vmul.f32 %v1419_v8, %v2006_v36  ;;  %v1451_v10 = vsel %vm902_vm9, 1.0, %v1774_v41  ;;  %vm427_vm10 = vcmp.eq.s32.totalorder %v394_v47, %v1997_v28  ;;  %vm558_vm11 = vcmp.eq.s32.totalorder %v394_v47, %v2004_v35 }
  0x8f   : > { %v1014_v11 = vadd.f32 %v982_v1, %v851_v23  ;;  %v705_v12 = vadd.f32 %v673_v7, %v542_v4  ;;  %v999_v13 = vmul.f32 %v1451_v10, %v2013_v40  ;;  %v1337_v14 = vsel %vm427_vm10, 1.0, %v1774_v41 }
  0x90   : > { %v524_v15 = vmul.f32 %v1337_v14, %v2002_v34  ;;  %v1369_v24 = vsel %vm558_vm11, 1.0, %v1774_v41  ;;  %vm721_vm12 = vcmp.eq.s32.totalorder %v394_v47, %v2011_v38  ;;  %vm884_vm13 = vcmp.eq.s32.totalorder %v394_v47, %v2019_v43 }
  0x91   : > { %1060 = vmatpush.msra.mxu0 %v1014_v11  ;;  %v868_v18 = vadd.f32 %v836_v9, %v705_v12  ;;  %v655_v19 = vmul.f32 %v1369_v24, %v2009_v37  ;;  %v1401_v20 = vsel %vm721_vm12, 1.0, %v1774_v41  ;;  %v1433_v22 = vsel %vm884_vm13, 1.0, %v1774_v41 }
  0x92   : > { %v818_v26 = vmul.f32 %v1401_v20, %v2006_v36  ;;  %v981_v16 = vmul.f32 %v1433_v22, %v2013_v40  ;;  %v411_v27 = vadd.s32 184, %v1972_v5  ;;  %v393_v29 = vadd.s32 40, %v1972_v5 }
  0x93   : > { %v1031_v30 = vadd.f32 %v999_v13, %v868_v18  ;;  %v687_v31 = vadd.f32 %v655_v19, %v524_v15  ;;  %v410_v32 = vadd.s32 176, %v1972_v5  ;;  %v392_v25 = vadd.s32 32, %v1972_v5 }
  0x94   : > { %vm444_vm14 = vcmp.eq.s32.totalorder %v411_v27, %v1997_v28  ;;  %vm575_vm15 = vcmp.eq.s32.totalorder %v411_v27, %v2004_v35  ;;  %vm738_vm0 = vcmp.eq.s32.totalorder %v411_v27, %v2011_v38  ;;  %vm901_vm1 = vcmp.eq.s32.totalorder %v411_v27, %v2019_v43  ;;  %v1039_v27 = vld [vmem:[%s307_s8] sm:$0xff]  ;;  %s1464_s8 = sshll.u32 %s1760_s28, 1 }
  0x95   : > { %1079 = vmatpush.msra.mxu1 %v1031_v30  ;;  %v850_v39 = vadd.f32 %v818_v26, %v687_v31  ;;  %v1354_v42 = vsel %vm444_vm14, 1.0, %v1774_v41  ;;  %v1386_v44 = vsel %vm575_vm15, 1.0, %v1774_v41  ;;  %v1418_v45 = vsel %vm738_vm0, 1.0, %v1774_v41  ;;  %1047 = vst [vmem:[#allocation1] ss:$2 sm:$0xff] %v1039_v27  ;;  %s1181_s13 = sadd.s32 %s1756_s27, %s1464_s8 }
  0x96   : > { %v541_v46 = vmul.f32 %v1354_v42, %v2002_v34  ;;  %v672_v47 = vmul.f32 %v1386_v44, %v2009_v37  ;;  %v835_v48 = vmul.f32 %v1418_v45, %v2006_v36  ;;  %v1450_v17 = vsel %vm901_vm1, 1.0, %v1774_v41  ;;  %s1465_s18 = sshll.u32 %s1181_s13, 3 }
  0x97   : > { %v1013_v49 = vadd.f32 %v981_v16, %v850_v39  ;;  %v998_v50 = vmul.f32 %v1450_v17, %v2013_v40  ;;  %vm426_vm2 = vcmp.eq.s32.totalorder %v393_v29, %v1997_v28  ;;  %vm557_vm3 = vcmp.eq.s32.totalorder %v393_v29, %v2004_v35  ;;  %s1183_s28 = scalar_lea.hbm %s2572_s9, %s1465_s18 }
  0x98   : > { %v704_v33 = vadd.f32 %v672_v47, %v541_v46  ;;  %v1336_v51 = vsel %vm426_vm2, 1.0, %v1774_v41  ;;  %v1368_v52 = vsel %vm557_vm3, 1.0, %v1774_v41  ;;  %vm720_vm4 = vcmp.eq.s32.totalorder %v393_v29, %v2011_v38  ;;  %s1187_s8 = sshll.u32 %s1183_s28, 4  ;;  %s1188_s8 = int_to_ptr.hbm [resolvable:$true] %s1187_s8 }
  0x99   : > { %1061 = vmatpush.msra.mxu0 %v1013_v49  ;;  %v523_v53 = vmul.f32 %v1336_v51, %v2002_v34  ;;  %v654_v54 = vmul.f32 %v1368_v52, %v2009_v37  ;;  %v1400_v55 = vsel %vm720_vm4, 1.0, %v1774_v41  ;;  %vm883_vm5 = vcmp.eq.s32.totalorder %v393_v29, %v2019_v43  ;;  %s1660_s13 = sshra.s32 %s1188_s8, 4  ;;  %s1661_s13 = int_to_ptr.hbm [resolvable:$true] %s1660_s13 }
  0x9a   : > { %v867_v56 = vadd.f32 %v835_v48, %v704_v33  ;;  %v817_v21 = vmul.f32 %v1400_v55, %v2006_v36  ;;  %v1432_v57 = vsel %vm883_vm5, 1.0, %v1774_v41  ;;  %vm443_vm6 = vcmp.eq.s32.totalorder %v410_v32, %v1997_v28  ;;  %s1662_s12 = scalar_lea.hbm %s1661_s13, 8  ;;  %p1667_p5 = scmp.lt.s32.totalorder %s1661_s13, %s2572_s9 }
  0x9b   : > { %v686_v58 = vadd.f32 %v654_v54, %v523_v53  ;;  %v980_v59 = vmul.f32 %v1432_v57, %v2013_v40  ;;  %v1353_v60 = vsel %vm443_vm6, 1.0, %v1774_v41  ;;  %vm574_vm7 = vcmp.eq.s32.totalorder %v410_v32, %v2004_v35  ;;  %p1663_p8 = scmp.ne.s32.totalorder %s1661_s13, %s1662_s12  ;;  %p1668_p7 = scmp.lt.s32.totalorder %s1666_s19, %s1662_s12 }
  0x9c   : > { %v1030_v61 = vadd.f32 %v998_v50, %v867_v56  ;;  %v540_v62 = vmul.f32 %v1353_v60, %v2002_v34  ;;  %v1385_v63 = vsel %vm574_vm7, 1.0, %v1774_v41  ;;  %vm737_vm8 = vcmp.eq.s32.totalorder %v410_v32, %v2011_v38 }
  0x9d   : > { %v849_v0 = vadd.f32 %v817_v21, %v686_v58  ;;  %v671_v1 = vmul.f32 %v1385_v63, %v2009_v37  ;;  %v1417_v2 = vsel %vm737_vm8, 1.0, %v1774_v41  ;;  %vm900_vm9 = vcmp.eq.s32.totalorder %v410_v32, %v2019_v43  ;;  %p1664_p0 = pnand %p1663_p8, %p1899_p9  ;;  %p1669_p10 = por %p1668_p7, %p1667_p5 }
  0x9e   : > { %1080 = vmatpush.msra.mxu1 %v1030_v61  ;;  %v834_v3 = vmul.f32 %v1417_v2, %v2006_v36  ;;  %v1449_v4 = vsel %vm900_vm9, 1.0, %v1774_v41  ;;  %vm425_vm10 = vcmp.eq.s32.totalorder %v392_v25, %v1997_v28  ;;  %vm556_vm11 = vcmp.eq.s32.totalorder %v392_v25, %v2004_v35 }
  0x9f   : > { %v1012_v6 = vadd.f32 %v980_v59, %v849_v0  ;;  %v703_v23 = vadd.f32 %v671_v1, %v540_v62  ;;  %v997_v7 = vmul.f32 %v1449_v4, %v2013_v40  ;;  %v1335_v8 = vsel %vm425_vm10, 1.0, %v1774_v41  ;;  %p1665_p4 = pneg %p1664_p0 }
  0xa0   : > { %v522_v9 = vmul.f32 %v1335_v8, %v2002_v34  ;;  %v1367_v10 = vsel %vm556_vm11, 1.0, %v1774_v41  ;;  %vm719_vm12 = vcmp.eq.s32.totalorder %v392_v25, %v2011_v38  ;;  %vm882_vm13 = vcmp.eq.s32.totalorder %v392_v25, %v2019_v43 }
  0xa1   : > { %1062 = vmatpush.msra.mxu0 %v1012_v6  ;;  %v866_v11 = vadd.f32 %v834_v3, %v703_v23  ;;  %v653_v12 = vmul.f32 %v1367_v10, %v2009_v37  ;;  %v1399_v13 = vsel %vm719_vm12, 1.0, %v1774_v41  ;;  %v1431_v14 = vsel %vm882_vm13, 1.0, %v1774_v41  ;;  %p1670_p12 = pnand %p1669_p10, %p1665_p4 }
  0xa2   : > { %v816_v15 = vmul.f32 %v1399_v13, %v2006_v36  ;;  %v979_v24 = vmul.f32 %v1431_v14, %v2013_v40  ;;  %v409_v18 = vadd.s32 168, %v1972_v5  ;;  %v391_v19 = vadd.s32 24, %v1972_v5 }
  0xa3   : > { %v1029_v20 = vadd.f32 %v997_v7, %v866_v11  ;;  %v685_v22 = vadd.f32 %v653_v12, %v522_v9  ;;  %v408_v26 = vadd.s32 160, %v1972_v5  ;;  %v2328_v16 = vadd.s32 16, %v1972_v5 }
  0xa4   : > { %vm442_vm14 = vcmp.eq.s32.totalorder %v409_v18, %v1997_v28  ;;  %vm573_vm15 = vcmp.eq.s32.totalorder %v409_v18, %v2004_v35  ;;  %vm736_vm0 = vcmp.eq.s32.totalorder %v409_v18, %v2011_v38  ;;  %vm899_vm1 = vcmp.eq.s32.totalorder %v409_v18, %v2019_v43 }
  0xa5   : > { %1081 = vmatpush.msra.mxu1 %v1029_v20  ;;  %v848_v29 = vadd.f32 %v816_v15, %v685_v22  ;;  %v1352_v30 = vsel %vm442_vm14, 1.0, %v1774_v41  ;;  %v1384_v31 = vsel %vm573_vm15, 1.0, %v1774_v41  ;;  %v1416_v32 = vsel %vm736_vm0, 1.0, %v1774_v41 }
  0xa6   : > { %v539_v25 = vmul.f32 %v1352_v30, %v2002_v34  ;;  %v670_v39 = vmul.f32 %v1384_v31, %v2009_v37  ;;  %v833_v42 = vmul.f32 %v1416_v32, %v2006_v36  ;;  %v1448_v44 = vsel %vm899_vm1, 1.0, %v1774_v41 }
  0xa7   : > { %v1011_v45 = vadd.f32 %v979_v24, %v848_v29  ;;  %v996_v46 = vmul.f32 %v1448_v44, %v2013_v40  ;;  %vm424_vm2 = vcmp.eq.s32.totalorder %v391_v19, %v1997_v28  ;;  %vm555_vm3 = vcmp.eq.s32.totalorder %v391_v19, %v2004_v35 }
  0xa8   : > { %v702_v47 = vadd.f32 %v670_v39, %v539_v25  ;;  %v1334_v48 = vsel %vm424_vm2, 1.0, %v1774_v41  ;;  %v1366_v17 = vsel %vm555_vm3, 1.0, %v1774_v41  ;;  %vm718_vm4 = vcmp.eq.s32.totalorder %v391_v19, %v2011_v38 }
  0xa9   : > { %1063 = vmatpush.msra.mxu0 %v1011_v45  ;;  %v521_v49 = vmul.f32 %v1334_v48, %v2002_v34  ;;  %v652_v50 = vmul.f32 %v1366_v17, %v2009_v37  ;;  %v1398_v33 = vsel %vm718_vm4, 1.0, %v1774_v41  ;;  %vm881_vm5 = vcmp.eq.s32.totalorder %v391_v19, %v2019_v43 }
  0xaa   : > { %v865_v51 = vadd.f32 %v833_v42, %v702_v47  ;;  %v815_v52 = vmul.f32 %v1398_v33, %v2006_v36  ;;  %v1430_v53 = vsel %vm881_vm5, 1.0, %v1774_v41  ;;  %vm441_vm6 = vcmp.eq.s32.totalorder %v408_v26, %v1997_v28 }
  0xab   : > { %v684_v54 = vadd.f32 %v652_v50, %v521_v49  ;;  %v978_v55 = vmul.f32 %v1430_v53, %v2013_v40  ;;  %v1351_v56 = vsel %vm441_vm6, 1.0, %v1774_v41  ;;  %vm572_vm7 = vcmp.eq.s32.totalorder %v408_v26, %v2004_v35 }
  0xac   : > { %v1028_v21 = vadd.f32 %v996_v46, %v865_v51  ;;  %v538_v57 = vmul.f32 %v1351_v56, %v2002_v34  ;;  %v1383_v58 = vsel %vm572_vm7, 1.0, %v1774_v41  ;;  %vm735_vm8 = vcmp.eq.s32.totalorder %v408_v26, %v2011_v38 }
  0xad   : > { %v847_v59 = vadd.f32 %v815_v52, %v684_v54  ;;  %v669_v60 = vmul.f32 %v1383_v58, %v2009_v37  ;;  %v1415_v61 = vsel %vm735_vm8, 1.0, %v1774_v41  ;;  %vm898_vm9 = vcmp.eq.s32.totalorder %v408_v26, %v2019_v43 }
  0xae   : > { %1082 = vmatpush.msra.mxu1 %v1028_v21  ;;  %v832_v62 = vmul.f32 %v1415_v61, %v2006_v36  ;;  %v1447_v63 = vsel %vm898_vm9, 1.0, %v1774_v41  ;;  %vm423_vm10 = vcmp.eq.s32.totalorder %v2328_v16, %v1997_v28  ;;  %vm554_vm11 = vcmp.eq.s32.totalorder %v2328_v16, %v2004_v35 }
  0xaf   : > { %v1010_v0 = vadd.f32 %v978_v55, %v847_v59  ;;  %v701_v1 = vadd.f32 %v669_v60, %v538_v57  ;;  %v995_v2 = vmul.f32 %v1447_v63, %v2013_v40  ;;  %v1333_v3 = vsel %vm423_vm10, 1.0, %v1774_v41 }
  0xb0   : > { %v520_v4 = vmul.f32 %v1333_v3, %v2002_v34  ;;  %v1365_v6 = vsel %vm554_vm11, 1.0, %v1774_v41  ;;  %vm717_vm12 = vcmp.eq.s32.totalorder %v2328_v16, %v2011_v38  ;;  %vm880_vm13 = vcmp.eq.s32.totalorder %v2328_v16, %v2019_v43 }
  0xb1   : > { %1064 = vmatpush.msra.mxu0 %v1010_v0  ;;  %v864_v23 = vadd.f32 %v832_v62, %v701_v1  ;;  %v651_v7 = vmul.f32 %v1365_v6, %v2009_v37  ;;  %v1397_v8 = vsel %vm717_vm12, 1.0, %v1774_v41  ;;  %v1429_v9 = vsel %vm880_vm13, 1.0, %v1774_v41 }
  0xb2   : > { %v814_v10 = vmul.f32 %v1397_v8, %v2006_v36  ;;  %v977_v11 = vmul.f32 %v1429_v9, %v2013_v40  ;;  %v407_v12 = vadd.s32 152, %v1972_v5  ;;  %v389_v13 = vadd.s32 8, %v1972_v5 }
  0xb3   : > { %v1027_v14 = vadd.f32 %v995_v2, %v864_v23  ;;  %v683_v15 = vadd.f32 %v651_v7, %v520_v4  ;;  %v406_v24 = vadd.s32 144, %v1972_v5  ;;  %vm421_vm14 = vcmp.eq.s32.totalorder %v1972_v5, %v1997_v28 }
  0xb4   : > { %vm440_vm15 = vcmp.eq.s32.totalorder %v407_v12, %v1997_v28  ;;  %vm571_vm0 = vcmp.eq.s32.totalorder %v407_v12, %v2004_v35  ;;  %vm734_vm1 = vcmp.eq.s32.totalorder %v407_v12, %v2011_v38  ;;  %vm897_vm2 = vcmp.eq.s32.totalorder %v407_v12, %v2019_v43 }
  0xb5   : > { %1083 = vmatpush.msra.mxu1 %v1027_v14  ;;  %v846_v18 = vadd.f32 %v814_v10, %v683_v15  ;;  %v1350_v19 = vsel %vm440_vm15, 1.0, %v1774_v41  ;;  %v1382_v20 = vsel %vm571_vm0, 1.0, %v1774_v41  ;;  %v1414_v22 = vsel %vm734_vm1, 1.0, %v1774_v41 }
  0xb6   : > { %v537_v26 = vmul.f32 %v1350_v19, %v2002_v34  ;;  %v668_v16 = vmul.f32 %v1382_v20, %v2009_v37  ;;  %v831_v27 = vmul.f32 %v1414_v22, %v2006_v36  ;;  %v1446_v29 = vsel %vm897_vm2, 1.0, %v1774_v41 }
  0xb7   : > { %v1009_v30 = vadd.f32 %v977_v11, %v846_v18  ;;  %v994_v31 = vmul.f32 %v1446_v29, %v2013_v40  ;;  %vm422_vm3 = vcmp.eq.s32.totalorder %v389_v13, %v1997_v28  ;;  %vm553_vm4 = vcmp.eq.s32.totalorder %v389_v13, %v2004_v35 }
  0xb8   : > { %v700_v32 = vadd.f32 %v668_v16, %v537_v26  ;;  %v1332_v25 = vsel %vm422_vm3, 1.0, %v1774_v41  ;;  %v1364_v39 = vsel %vm553_vm4, 1.0, %v1774_v41  ;;  %vm716_vm5 = vcmp.eq.s32.totalorder %v389_v13, %v2011_v38  ;;  %v1048_v26 = vld.sshfl [vmem:[#allocation1] sm:$0xff pattern:$0x75316420] }
  0xb9   : > { %1065 = vmatpush.msra.mxu0 %v1009_v30  ;;  %v519_v42 = vmul.f32 %v1332_v25, %v2002_v34  ;;  %v650_v44 = vmul.f32 %v1364_v39, %v2009_v37  ;;  %v1396_v45 = vsel %vm716_vm5, 1.0, %v1774_v41  ;;  %vm879_vm6 = vcmp.eq.s32.totalorder %v389_v13, %v2019_v43 }
  0xba   : > { %v863_v46 = vadd.f32 %v831_v27, %v700_v32  ;;  %v813_v47 = vmul.f32 %v1396_v45, %v2006_v36  ;;  %v1428_v48 = vsel %vm879_vm6, 1.0, %v1774_v41  ;;  %vm439_vm7 = vcmp.eq.s32.totalorder %v406_v24, %v1997_v28  ;;  %v1049_v45 = vld.sshfl [vmem:[#allocation1 + $0x8] sm:$0xff pattern:$0x75316420] }
  0xbb   : > { %v682_v17 = vadd.f32 %v650_v44, %v519_v42  ;;  %v976_v49 = vmul.f32 %v1428_v48, %v2013_v40  ;;  %v1349_v50 = vsel %vm439_vm7, 1.0, %v1774_v41  ;;  %vm570_vm8 = vcmp.eq.s32.totalorder %v406_v24, %v2004_v35  ;;  %v1095_v44 = vld [vmem:[%s2549_s5] sm:$0xff] }
  0xbc   : > { %v1026_v33 = vadd.f32 %v994_v31, %v863_v46  ;;  %v536_v51 = vmul.f32 %v1349_v50, %v2002_v34  ;;  %v1381_v52 = vsel %vm570_vm8, 1.0, %v1774_v41  ;;  %vm733_vm9 = vcmp.eq.s32.totalorder %v406_v24, %v2011_v38  ;;  %v1093_v48 = vld [vmem:[%s2548_s4] sm:$0xff] }
  0xbd   : > { %v845_v53 = vadd.f32 %v813_v47, %v682_v17  ;;  %v667_v54 = vmul.f32 %v1381_v52, %v2009_v37  ;;  %v1413_v55 = vsel %vm733_vm9, 1.0, %v1774_v41  ;;  %vm896_vm10 = vcmp.eq.s32.totalorder %v406_v24, %v2019_v43  ;;  %v1040_v24 = vld [vmem:[%s2547_s3] sm:$0xf]  ;;  %v1094_v17 = vld [vmem:[%s2548_s4 + $0x8] sm:$0xff] }
  0xbe   : > { %1084 = vmatpush.msra.mxu1 %v1026_v33  ;;  %v830_v56 = vmul.f32 %v1413_v55, %v2006_v36  ;;  %v1445_v21 = vsel %vm896_vm10, 1.0, %v1774_v41  ;;  %v1331_v57 = vsel %vm421_vm14, 1.0, %v1774_v41  ;;  %vm552_vm11 = vcmp.eq.s32.totalorder %v1972_v5, %v2004_v35 }
  0xbf   : > { %v1008_v58 = vadd.f32 %v976_v49, %v845_v53  ;;  %v699_v59 = vadd.f32 %v667_v54, %v536_v51  ;;  %v993_v60 = vmul.f32 %v1445_v21, %v2013_v40  ;;  %v518_v61 = vmul.f32 %v1331_v57, %v2002_v34 }
  0xc0   : > { %v1363_v62 = vsel %vm552_vm11, 1.0, %v1774_v41  ;;  %vm715_vm12 = vcmp.eq.s32.totalorder %v1972_v5, %v2011_v38  ;;  %vm878_vm13 = vcmp.eq.s32.totalorder %v1972_v5, %v2019_v43  ;;  %v405_v63 = vadd.s32 136, %v1972_v5 }
  0xc1   : > { %1066 = vmatpush.msra.mxu0 %v1008_v58  ;;  %v862_v0 = vadd.f32 %v830_v56, %v699_v59  ;;  %v649_v1 = vmul.f32 %v1363_v62, %v2009_v37  ;;  %v1395_v2 = vsel %vm715_vm12, 1.0, %v1774_v41  ;;  %v1427_v3 = vsel %vm878_vm13, 1.0, %v1774_v41 }
  0xc2   : > { %v812_v4 = vmul.f32 %v1395_v2, %v2006_v36  ;;  %v975_v6 = vmul.f32 %v1427_v3, %v2013_v40  ;;  %vm438_vm14 = vcmp.eq.s32.totalorder %v405_v63, %v1997_v28  ;;  %vm569_vm15 = vcmp.eq.s32.totalorder %v405_v63, %v2004_v35 }
  0xc3   : > { %v1025_v23 = vadd.f32 %v993_v60, %v862_v0  ;;  %v681_v7 = vadd.f32 %v649_v1, %v518_v61  ;;  %v1348_v8 = vsel %vm438_vm14, 1.0, %v1774_v41  ;;  %v1380_v9 = vsel %vm569_vm15, 1.0, %v1774_v41 }
  0xc4   : > { %v535_v10 = vmul.f32 %v1348_v8, %v2002_v34  ;;  %v666_v11 = vmul.f32 %v1380_v9, %v2009_v37  ;;  %vm732_vm0 = vcmp.eq.s32.totalorder %v405_v63, %v2011_v38  ;;  %vm895_vm1 = vcmp.eq.s32.totalorder %v405_v63, %v2019_v43 }
  0xc5   : > { %1085 = vmatpush.msra.mxu1 %v1025_v23  ;;  %v844_v12 = vadd.f32 %v812_v4, %v681_v7  ;;  %v1412_v13 = vsel %vm732_vm0, 1.0, %v1774_v41  ;;  %v1444_v14 = vsel %vm895_vm1, 1.0, %v1774_v41  ;;  %v404_v15 = vadd.s32 128, %v1972_v5  ;;  %v1167_v7 = vld [vmem:[%s357_s6] sm:$0xff] }
  0xc6   : > { %v698_v18 = vadd.f32 %v666_v11, %v535_v10  ;;  %v829_v19 = vmul.f32 %v1412_v13, %v2006_v36  ;;  %v992_v20 = vmul.f32 %v1444_v14, %v2013_v40  ;;  %v1775_v16 = vmov 0  }
  0xc7   : > { %v1007_v22 = vadd.f32 %v975_v6, %v844_v12  ;;  %vm437_vm2 = vcmp.eq.s32.totalorder %v404_v15, %v1997_v28  ;;  %vm568_vm3 = vcmp.eq.s32.totalorder %v404_v15, %v2004_v35  ;;  %vm731_vm4 = vcmp.eq.s32.totalorder %v404_v15, %v2011_v38  ;;  %1580 = vset.pattern.permute.xlu0 %v1775_v16 }
  0xc8   : > { %v861_v5 = vadd.f32 %v829_v19, %v698_v18  ;;  %v1347_v27 = vsel %vm437_vm2, 1.0, %v1774_v41  ;;  %v1379_v29 = vsel %vm568_vm3, 1.0, %v1774_v41  ;;  %v1411_v30 = vsel %vm731_vm4, 1.0, %v1774_v41  ;;  %1043 = vperm.xlu0 %1580, %v1040_v24   ;;  %1581 = vset.pattern.permute.xlu1 %v1775_v16 }
  0xc9   : > { %1067 = vmatpush.msra.mxu0 %v1007_v22  ;;  %v534_v31 = vmul.f32 %v1347_v27, %v2002_v34  ;;  %v665_v28 = vmul.f32 %v1379_v29, %v2009_v37  ;;  %v828_v35 = vmul.f32 %v1411_v30, %v2006_v36  ;;  %vm894_vm5 = vcmp.eq.s32.totalorder %v404_v15, %v2019_v43  ;;  %v1096_v36 = vld [vmem:[%s2549_s5 + $0x8] sm:$0xff] }
  0xca   : > { %v1024_v38 = vadd.f32 %v992_v20, %v861_v5  ;;  %1068 = vmatmul.f32.vlgmr.msra.gmra.mxu0 %v1048_v26  ;;  %v1443_v32 = vsel %vm894_vm5, 1.0, %v1774_v41  ;;  %1104 = vperm.xlu1 %1581, %v1096_v36   ;;  %vm1114_vm6 = vcmask 1043456   ;;  %vm1107_vm7 = vcmask 31744  }
  0xcb   : > { %v697_v25 = vadd.f32 %v665_v28, %v534_v31  ;;  %v991_v39 = vmul.f32 %v1443_v32, %v2013_v40 }
  0xcc   : > { %1086 = vmatpush.msra.mxu1 %v1024_v38 }
  0xcd   : > { %v860_v42 = vadd.f32 %v828_v35, %v697_v25 }
  0xcf   : > { %v1023_v34 = vadd.f32 %v991_v39, %v860_v42 }
  0xd0   : > { %1099 = vperm.xlu0 %1580, %v1095_v44  }
  0xd1   : > { %1087 = vmatpush.msra.mxu1 %v1023_v34 }
  0xd2   : > { %1088 = vmatmul.f32.vlgmr.msra.gmra.mxu1 %v1049_v45 }
 0x13a   : > { %v1044_v41 = vpop.permute.xlu0 %1043 }
 0x13c   : > { %v1105_v50 = vpop.permute.xlu1 %1104 }
 0x142   : > { %v1100_v33 = vpop.permute.xlu0 %1099 }
 0x147   : > { %v1069_v37 = vpop.f32.mrf.mxu0 }
 0x148   : > { %v1070_v43 = vadd.f32 %v1069_v37, %v1044_v41 }
 0x14f   : > { %v1089_v40 = vpop.f32.mrf.mxu1 }
 0x150   : > { %v1090_v46 = vadd.f32 %v1089_v40, %v1070_v43 }
 0x152   : > { %v1092_v47 = vmax.f32 %v1090_v46, 0.0 }
 0x154   : > { %1459 = vmatpush.msk.msra.mxu2 %vm1114_vm6, %v1092_v47 }
 0x155   : > { %1460 = vmatmul.msk.f32.vlgmr.msra.gmra.mxu2 %vm1107_vm7, %v1093_v48 }
 0x15d   : > { %1461 = vmatmul.msk.f32.gmra.mxu2 %vm1107_vm7, %v1094_v17 }
 0x1d8   : > { %v1135_v49 = vpop.f32.mrf.mxu2 }
 0x1d9   : > { %v1136_v52 = vadd.f32 %v1135_v49, %v1100_v33 }
 0x1e0   : > { %v1138_v51 = vpop.f32.mrf.mxu2 }
 0x1e1   : > { %v1139_v53 = vadd.f32 %v1138_v51, %v1105_v50 }
 0x1e3   : > { %v1141_v54 = vmax.f32 %v1136_v52, %v1139_v53 }
 0x1e5   : > { %v1142_v55 = vrot.slane %v1141_v54, 4 }
 0x1e7   : > { %v1143_v56 = vmax.f32 %v1141_v54, %v1142_v55 }
 0x1e9   : > { %v1144_v21 = vrot.slane %v1143_v56, 2 }
 0x1eb   : > { %v1145_v57 = vmax.f32 %v1143_v56, %v1144_v21 }
 0x1ed   : > { %v1146_v58 = vrot.slane %v1145_v57, 1 }
 0x1ef   : > { %v1147_v59 = vmax.f32 %v1145_v57, %v1146_v58 }
 0x1f1   : > { %v1462_v60 = vmul.f32 -1.442695, %v1147_v59 }
 0x1f3   : > { %1582 = vpow2.f32 %v1462_v60 }
 0x1f9   : > { %v1583_v61 = vpop.eup %1582 }
 0x1fa   : > { %v1151_v62 = vadd.f32 1.0, %v1583_v61 }
 0x1fc   : > { %1584 = vrcp.f32 %v1151_v62  ;;  %v1163_v2 = vand.u32 2147483648, %v1151_v62  ;;  %v1161_v4 = vand.u32 2147483647, %v1151_v62  ;;  %vm1157_vm9 = vweird.f32 %v1151_v62 }
 0x1fe   : > { %v1164_v23 = vor.u32 1.1754944e-38, %v1163_v2  ;;  %vm1162_vm11 = vcmp.eq.f32.partialorder %v1161_v4, 8.507059e+37 }
 0x202   : > { %v1585_v63 = vpop.eup %1584 }
 0x203   : > { %v1153_v0 = vmul.f32 %v1585_v63, %v1151_v62  ;;  %vm1158_vm8 = vweird.f32 %v1585_v63 }
 0x204   : > { %vm1159_vm10 = vmor %vm1157_vm9, %vm1158_vm8 }
 0x205   : > { %v1154_v1 = vsub.f32 1.0, %v1153_v0 }
 0x207   : > { %v1155_v3 = vmul.f32 %v1585_v63, %v1154_v1 }
 0x209   : > { %v1156_v6 = vadd.f32 %v1585_v63, %v1155_v3 }
 0x20b   : > { %v1160_v8 = vsel %vm1159_vm10, %v1585_v63, %v1156_v6 }
 0x20c   : > { %v1165_v9 = vsel %vm1162_vm11, %v1164_v23, %v1160_v8 }
 0x20d   : > { %v1168_v10 = vmul.f32 %v1167_v7, %v1165_v9 }
 0x20f   : > { %1169 = vst [vmem:[%s349_s10] sm:$0xff] %v1168_v10 }
 0x210   : > { %1673 = shalt.err (!%p1670_p12)
}
 0x211   : > { %1475 = dma.vmem_to_hbm [thread:$0]  (%p1899_p9), %s1186_s17, 128, %s1188_s8, %s1171_s16  }
 0x212 PF: > { %s2574_s15 = sld [smem:[#allocation11_spill]]  ;;  %p1489_p3 = scmp.ge.s32.totalorder %s1772_s7, 2 }
 0x214   : > { %p1485_p1 = pnand %p1489_p3, %p1905_p13 }
 0x216   : > { %p1486_p11 = pneg %p1485_p1 }
 0x218   : > { %s1199_s11 = sand.u32 1, %s2574_s15  }
 0x219   : > { %s1200_s28 = scalar_lea.sflag [#allocation4], %s1199_s11 }
 0x21a   : > { %1727 = dma.done.wait (%p1486_p11), %s1200_s28, 128  }
 0x21b   : > { %1729 = vsyncadd (%p1486_p11), %s1200_s28, 4294967168  ;;  %s25_s7 = sadd.s32 1, %s1772_s7   ;;  %s2576_s27 = sld [smem:[#allocation16_spill]] }
 0x21c   : > { %p22_p2 = scmp.ge.s32.totalorder %s25_s7, 6   ;;  %s2577_s10 = sld [smem:[#allocation12_spill]] }
 0x21d   : > { %s2578_s17 = sld [smem:[#allocation13_spill]]  ;;  %s2579_s21 = smov %s1736_s22 }
 0x21e   : > { %s2580_s22 = smov %s1740_s23  ;;  %s2581_s23 = smov %s1932_s20 }
 0x21f   : > { %s2582_s24 = smov %s1748_s25  ;;  %s2583_s25 = smov %s1752_s26 }
 0x220   : > { %s2586_s28 = smov %s1768_s30  ;;  %24 = sbr.rel (!%p22_p2) target bundleno = 13 (0xd), region = 105 }
 0x221   : > { %s2584_s26 = smov %s2576_s27  ;;  %s2585_s27 = smov %s1764_s29 }
 0x222   : > { %s2587_s29 = smov %s2577_s10 }
 0x223   : > { %s2588_s30 = smov %s2578_s17 }
 0x225   :  { %1206 = vsyncpa [#allocation3], 1 }
 0x226   :  { %1208 = vsyncpa [#allocation3 + $0x1], 1 }
 0x227   :  { %1209 = vsyncpa [#allocation6], 1 }
 0x228   :  { %1211 = vsyncpa [#allocation6 + $0x1], 1 }
 0x229   :  { %1212 = vsyncpa [#allocation4], 1 }
 0x22a   :  { %1214 = vsyncpa [#allocation4 + $0x1], 1 }

</bundles_post_ra>
